<compile_context>
chip_gen: v5e
topology: v5e:2x2
jax: 0.10.0
libtpu: 0.0.40
codegen_flags: <defaults>
</compile_context>

<pallas_src>
import functools

import jax
import jax.numpy as jnp
from jax import lax
from jax.experimental import pallas as pl
from jax.experimental.pallas import tpu as pltpu


def lstm_fc_kernel(x_ref, wih_ref, b_ref, whh_ref, wfc_ref, bfc_ref, out_ref):
    """Fused LSTM (input projection + recurrence) + final Linear.

    x_ref   : (T, B, I)  f32   time-major input
    wih_ref : (I, 4Hp)   f32   W_ih^T, gate order repacked to [i, f, o, g]
    b_ref   : (1, 4Hp)   f32   b_ih + b_hh, repacked / zero-padded
    whh_ref : (Hp, 4Hp)  bf16  W_hh^T, repacked / zero-padded
    wfc_ref : (Hp, Op)   f32   fc.weight^T, zero-padded
    bfc_ref : (1, Op)    f32   fc.bias, zero-padded
    out_ref : (B, Op)    f32   fc(h_T), lane-dense
    """
    T, B, I = x_ref.shape
    Hp = whh_ref.shape[0]

    h0 = jnp.zeros((B, Hp), jnp.float32)
    c0 = jnp.zeros((B, Hp), jnp.float32)

    def step(t, carry):
        h, c = carry
        x_t = x_ref[t]                                       # (B, I)
        # Input projection fused in-kernel. I == 1 => a broadcast multiply
        # (VPU); it does not depend on h, so the LLO scheduler can overlap it
        # with the recurrent matmul of the same (unrolled) step.
        if I == 1:
            xw_t = x_t * wih_ref[...] + b_ref[...]
        else:
            xw_t = (jnp.dot(x_t, wih_ref[...],
                            preferred_element_type=jnp.float32) + b_ref[...])
        # Recurrent matmul: bf16 operands, f32 accumulation. whh_ref is read
        # inside the dot (not hoisted into a 32-vreg live value) so it streams
        # VMEM -> MXU instead of pinning the register file across the unroll.
        gates = xw_t + jnp.dot(h.astype(whh_ref.dtype), whh_ref[...],
                               preferred_element_type=jnp.float32)
        # Gate order [i, f, o, g]: one sigmoid pass over 3*Hp, one tanh pass
        # over Hp; every slice is a 128-lane-aligned full vreg.
        sig = jax.nn.sigmoid(gates[:, :3 * Hp])
        g_g = jnp.tanh(gates[:, 3 * Hp:])
        i_g = sig[:, 0 * Hp:1 * Hp]
        f_g = sig[:, 1 * Hp:2 * Hp]
        o_g = sig[:, 2 * Hp:3 * Hp]
        # Padded-lane invariant: padded columns of W_ih/W_hh (hence the padded
        # g-gate lanes) are zero and h/c start at zero, so padded lanes of c/h
        # stay exactly zero even though padded i/f/o lanes read sigmoid(0)=0.5.
        c_new = f_g * c + i_g * g_g
        h_new = o_g * jnp.tanh(c_new)
        return h_new, c_new

    h_t, _ = lax.fori_loop(0, T, step, (h0, c0), unroll=True)

    # fc on the last hidden state; padded h lanes are zero and padded wfc rows
    # are zero, so padded lanes contribute nothing.
    out_ref[...] = (jnp.dot(h_t, wfc_ref[...],
                            preferred_element_type=jnp.float32)
                    + bfc_ref[...])


def prepare_params(params):
    """One-time weight repack / pad / transpose (keep OUT of the forward path)."""
    H = params["w_hh"].shape[1]          # w_hh: (4H, H)
    I = params["w_ih"].shape[1]          # w_ih: (4H, I)
    O = params["w_fc"].shape[0]          # w_fc: (O, H)
    Hp = ((H + 127) // 128) * 128        # 64 -> 128
    Op = ((O + 127) // 128) * 128        # 1  -> 128

    def repack(a):
        """PyTorch gate blocks [i, f, g, o] -> [i, f, o, g] along axis 0, each
        block zero-padded from H to Hp rows."""
        i_, f_, g_, o_ = (a[0 * H:1 * H], a[1 * H:2 * H],
                          a[2 * H:3 * H], a[3 * H:4 * H])
        pad = lambda blk: jnp.pad(blk, [(0, Hp - H)] + [(0, 0)] * (blk.ndim - 1))
        return jnp.concatenate([pad(i_), pad(f_), pad(o_), pad(g_)], axis=0)

    w_ih = params["w_ih"].astype(jnp.float32)
    w_hh = params["w_hh"].astype(jnp.float32)
    b_sum = (params["b_ih"] + params["b_hh"]).astype(jnp.float32)

    wih_t = repack(w_ih).T                                           # (I, 4Hp) f32
    b_row = repack(b_sum[:, None])[:, 0][None, :]                    # (1, 4Hp) f32
    whh_t = jnp.pad(repack(w_hh), ((0, 0), (0, Hp - H))).T           # (Hp, 4Hp)
    whh_t = whh_t.astype(jnp.bfloat16)                               # bf16 operands
    wfc_t = jnp.pad(params["w_fc"].astype(jnp.float32).T,
                    ((0, Hp - H), (0, Op - O)))                      # (Hp, Op) f32
    bfc = jnp.pad(params["b_fc"].astype(jnp.float32).reshape(1, O),
                  ((0, 0), (0, Op - O)))                             # (1, Op) f32

    packed = {"wih_t": wih_t, "b_row": b_row, "whh_t": whh_t,
              "wfc_t": wfc_t, "bfc": bfc}
    return packed, O


def weather_rnn_forward(x, packed, *, output_size):
    """x: (B, T, I) float32 -> (B, output_size) float32."""
    B, T, I = x.shape
    Op = packed["wfc_t"].shape[1]

    x_tbi = jnp.transpose(x, (1, 0, 2)).astype(jnp.float32)          # (T, B, I)

    vmem = pl.BlockSpec(memory_space=pltpu.MemorySpace.VMEM)
    out = pl.pallas_call(
        lstm_fc_kernel,
        out_shape=jax.ShapeDtypeStruct((B, Op), jnp.float32),
        in_specs=[vmem] * 6,
        out_specs=vmem,
    )(x_tbi, packed["wih_t"], packed["b_row"], packed["whh_t"],
      packed["wfc_t"], packed["bfc"])
    return out[:, :output_size]


def init_params(key, input_size, hidden_size, output_size):
    """Deterministic parameter init mimicking PyTorch shapes (uniform +-1/sqrt(H))."""
    ks = jax.random.split(key, 6)
    bound = 1.0 / jnp.sqrt(hidden_size)
    u = lambda k, shape: jax.random.uniform(k, shape, jnp.float32, -bound, bound)
    return {
        "w_ih": u(ks[0], (4 * hidden_size, input_size)),
        "w_hh": u(ks[1], (4 * hidden_size, hidden_size)),
        "b_ih": u(ks[2], (4 * hidden_size,)),
        "b_hh": u(ks[3], (4 * hidden_size,)),
        "w_fc": u(ks[4], (output_size, hidden_size)),
        "b_fc": u(ks[5], (output_size,)),
    }


def reference_forward(x, params):
    """Pure-JAX reference (PyTorch gate order, high-precision matmuls)."""
    H = params["w_hh"].shape[1]
    B, T, I = x.shape
    hp = jax.lax.Precision.HIGHEST
    h = jnp.zeros((B, H), jnp.float32)
    c = jnp.zeros((B, H), jnp.float32)
    b = params["b_ih"] + params["b_hh"]
    for t in range(T):
        gates = (jnp.dot(x[:, t, :], params["w_ih"].T, precision=hp)
                 + jnp.dot(h, params["w_hh"].T, precision=hp) + b)
        i_g = jax.nn.sigmoid(gates[:, 0 * H:1 * H])
        f_g = jax.nn.sigmoid(gates[:, 1 * H:2 * H])
        g_g = jnp.tanh(gates[:, 2 * H:3 * H])
        o_g = jax.nn.sigmoid(gates[:, 3 * H:4 * H])
        c = f_g * c + i_g * g_g
        h = o_g * jnp.tanh(c)
    return jnp.dot(h, params["w_fc"].T, precision=hp) + params["b_fc"]


if __name__ == "__main__":
    # Module defaults: input_size=1, hidden_size=64, output_size=1.
    B, T, I, H, O = 8, 8, 1, 64, 1

    key = jax.random.PRNGKey(0)
    k_x, k_p = jax.random.split(key)
    x = jax.random.normal(k_x, (B, T, I), dtype=jnp.float32)
    params = init_params(k_p, I, H, O)

    # One-time weight packing (outside the per-call forward path).
    packed, out_size = prepare_params(params)
    packed = jax.block_until_ready(packed)

    fwd = jax.jit(functools.partial(weather_rnn_forward, output_size=out_size))
    y = fwd(x, packed)
    y = jax.block_until_ready(y)

    assert y.shape == (B, O), y.shape
    y_ref = reference_forward(x, params)
    assert jnp.allclose(y, y_ref, atol=1e-2, rtol=1e-2), (
        float(jnp.max(jnp.abs(y - y_ref))))

    print("KERNEL_OK")
</pallas_src>

<mosaic_0001>
module attributes {stable_mosaic.version = 11 : i64} {
  func.func @lstm_fc_kernel(%arg0: memref<8x8x1xf32, #tpu.memory_space<vmem>>, %arg1: memref<1x512xf32, #tpu.memory_space<vmem>>, %arg2: memref<1x512xf32, #tpu.memory_space<vmem>>, %arg3: memref<128x512xbf16, #tpu.memory_space<vmem>>, %arg4: memref<128x128xf32, #tpu.memory_space<vmem>>, %arg5: memref<1x128xf32, #tpu.memory_space<vmem>>, %arg6: memref<8x128xf32, #tpu.memory_space<vmem>>) attributes {dimension_semantics = [], scalar_prefetch = 0 : i64, scratch_operands = 0 : i64, tpu.core_type = #tpu.core_type<tc>} {
    %cst = arith.constant 0.000000e+00 : f32
    %0 = vector.broadcast %cst : f32 to vector<8x128xf32>
    %cst_0 = arith.constant 0.000000e+00 : f32
    %1 = vector.broadcast %cst_0 : f32 to vector<8x128xf32>
    %c0_i32 = arith.constant 0 : i32
    %2 = arith.index_cast %c0_i32 : i32 to index
    %c0 = arith.constant 0 : index
    %c0_1 = arith.constant 0 : index
    %3 = vector.load %arg0[%2, %c0, %c0_1] : memref<8x8x1xf32, #tpu.memory_space<vmem>>, vector<1x8x1xf32>
    %4 = vector.shape_cast %3 : vector<1x8x1xf32> to vector<8x1xf32>
    %c0_2 = arith.constant 0 : index
    %c0_3 = arith.constant 0 : index
    %5 = vector.load %arg1[%c0_2, %c0_3] : memref<1x512xf32, #tpu.memory_space<vmem>>, vector<1x512xf32>
    %6 = vector.broadcast %4 : vector<8x1xf32> to vector<8x512xf32>
    %7 = vector.broadcast %5 : vector<1x512xf32> to vector<8x512xf32>
    %8 = arith.mulf %6, %7 : vector<8x512xf32>
    %c0_4 = arith.constant 0 : index
    %c0_5 = arith.constant 0 : index
    %9 = vector.load %arg2[%c0_4, %c0_5] : memref<1x512xf32, #tpu.memory_space<vmem>>, vector<1x512xf32>
    %10 = vector.broadcast %9 : vector<1x512xf32> to vector<8x512xf32>
    %11 = arith.addf %8, %10 : vector<8x512xf32>
    %12 = arith.truncf %0 : vector<8x128xf32> to vector<8x128xbf16>
    %c0_6 = arith.constant 0 : index
    %c0_7 = arith.constant 0 : index
    %13 = vector.load %arg3[%c0_6, %c0_7] : memref<128x512xbf16, #tpu.memory_space<vmem>>, vector<128x512xbf16>
    %cst_8 = arith.constant dense<0.000000e+00> : vector<8x512xf32>
    %14 = tpu.matmul %12, %13, %cst_8 {dimension_numbers = #tpu.dot_dimension_numbers<[1], [0], [0], [1], [0, 0, 1, 1], [], []>} : vector<8x128xbf16>, vector<128x512xbf16>, vector<8x512xf32> -> vector<8x512xf32>
    %15 = arith.addf %11, %14 : vector<8x512xf32>
    %16 = vector.extract_strided_slice %15 {offsets = [0, 0], sizes = [8, 384], strides = [1, 1]} : vector<8x512xf32> to vector<8x384xf32>
    %17 = arith.negf %16 : vector<8x384xf32>
    %18 = math.exp %17 : vector<8x384xf32>
    %cst_9 = arith.constant 1.000000e+00 : f32
    %19 = vector.broadcast %cst_9 : f32 to vector<8x384xf32>
    %20 = arith.addf %19, %18 : vector<8x384xf32>
    %21 = arith.divf %19, %20 : vector<8x384xf32>
    %22 = vector.extract_strided_slice %15 {offsets = [0, 384], sizes = [8, 128], strides = [1, 1]} : vector<8x512xf32> to vector<8x128xf32>
    %23 = math.tanh %22 : vector<8x128xf32>
    %24 = vector.extract_strided_slice %21 {offsets = [0, 0], sizes = [8, 128], strides = [1, 1]} : vector<8x384xf32> to vector<8x128xf32>
    %25 = vector.extract_strided_slice %21 {offsets = [0, 128], sizes = [8, 128], strides = [1, 1]} : vector<8x384xf32> to vector<8x128xf32>
    %26 = vector.extract_strided_slice %21 {offsets = [0, 256], sizes = [8, 128], strides = [1, 1]} : vector<8x384xf32> to vector<8x128xf32>
    %27 = arith.mulf %25, %1 : vector<8x128xf32>
    %28 = arith.mulf %24, %23 : vector<8x128xf32>
    %29 = arith.addf %27, %28 : vector<8x128xf32>
    %30 = math.tanh %29 : vector<8x128xf32>
    %31 = arith.mulf %26, %30 : vector<8x128xf32>
    %c1_i32 = arith.constant 1 : i32
    %32 = arith.index_cast %c1_i32 : i32 to index
    %c0_10 = arith.constant 0 : index
    %c0_11 = arith.constant 0 : index
    %33 = vector.load %arg0[%32, %c0_10, %c0_11] : memref<8x8x1xf32, #tpu.memory_space<vmem>>, vector<1x8x1xf32>
    %34 = vector.shape_cast %33 : vector<1x8x1xf32> to vector<8x1xf32>
    %c0_12 = arith.constant 0 : index
    %c0_13 = arith.constant 0 : index
    %35 = vector.load %arg1[%c0_12, %c0_13] : memref<1x512xf32, #tpu.memory_space<vmem>>, vector<1x512xf32>
    %36 = vector.broadcast %34 : vector<8x1xf32> to vector<8x512xf32>
    %37 = vector.broadcast %35 : vector<1x512xf32> to vector<8x512xf32>
    %38 = arith.mulf %36, %37 : vector<8x512xf32>
    %c0_14 = arith.constant 0 : index
    %c0_15 = arith.constant 0 : index
    %39 = vector.load %arg2[%c0_14, %c0_15] : memref<1x512xf32, #tpu.memory_space<vmem>>, vector<1x512xf32>
    %40 = vector.broadcast %39 : vector<1x512xf32> to vector<8x512xf32>
    %41 = arith.addf %38, %40 : vector<8x512xf32>
    %42 = arith.truncf %31 : vector<8x128xf32> to vector<8x128xbf16>
    %c0_16 = arith.constant 0 : index
    %c0_17 = arith.constant 0 : index
    %43 = vector.load %arg3[%c0_16, %c0_17] : memref<128x512xbf16, #tpu.memory_space<vmem>>, vector<128x512xbf16>
    %cst_18 = arith.constant dense<0.000000e+00> : vector<8x512xf32>
    %44 = tpu.matmul %42, %43, %cst_18 {dimension_numbers = #tpu.dot_dimension_numbers<[1], [0], [0], [1], [0, 0, 1, 1], [], []>} : vector<8x128xbf16>, vector<128x512xbf16>, vector<8x512xf32> -> vector<8x512xf32>
    %45 = arith.addf %41, %44 : vector<8x512xf32>
    %46 = vector.extract_strided_slice %45 {offsets = [0, 0], sizes = [8, 384], strides = [1, 1]} : vector<8x512xf32> to vector<8x384xf32>
    %47 = arith.negf %46 : vector<8x384xf32>
    %48 = math.exp %47 : vector<8x384xf32>
    %cst_19 = arith.constant 1.000000e+00 : f32
    %49 = vector.broadcast %cst_19 : f32 to vector<8x384xf32>
    %50 = arith.addf %49, %48 : vector<8x384xf32>
    %51 = arith.divf %49, %50 : vector<8x384xf32>
    %52 = vector.extract_strided_slice %45 {offsets = [0, 384], sizes = [8, 128], strides = [1, 1]} : vector<8x512xf32> to vector<8x128xf32>
    %53 = math.tanh %52 : vector<8x128xf32>
    %54 = vector.extract_strided_slice %51 {offsets = [0, 0], sizes = [8, 128], strides = [1, 1]} : vector<8x384xf32> to vector<8x128xf32>
    %55 = vector.extract_strided_slice %51 {offsets = [0, 128], sizes = [8, 128], strides = [1, 1]} : vector<8x384xf32> to vector<8x128xf32>
    %56 = vector.extract_strided_slice %51 {offsets = [0, 256], sizes = [8, 128], strides = [1, 1]} : vector<8x384xf32> to vector<8x128xf32>
    %57 = arith.mulf %55, %29 : vector<8x128xf32>
    %58 = arith.mulf %54, %53 : vector<8x128xf32>
    %59 = arith.addf %57, %58 : vector<8x128xf32>
    %60 = math.tanh %59 : vector<8x128xf32>
    %61 = arith.mulf %56, %60 : vector<8x128xf32>
    %c2_i32 = arith.constant 2 : i32
    %62 = arith.index_cast %c2_i32 : i32 to index
    %c0_20 = arith.constant 0 : index
    %c0_21 = arith.constant 0 : index
    %63 = vector.load %arg0[%62, %c0_20, %c0_21] : memref<8x8x1xf32, #tpu.memory_space<vmem>>, vector<1x8x1xf32>
    %64 = vector.shape_cast %63 : vector<1x8x1xf32> to vector<8x1xf32>
    %c0_22 = arith.constant 0 : index
    %c0_23 = arith.constant 0 : index
    %65 = vector.load %arg1[%c0_22, %c0_23] : memref<1x512xf32, #tpu.memory_space<vmem>>, vector<1x512xf32>
    %66 = vector.broadcast %64 : vector<8x1xf32> to vector<8x512xf32>
    %67 = vector.broadcast %65 : vector<1x512xf32> to vector<8x512xf32>
    %68 = arith.mulf %66, %67 : vector<8x512xf32>
    %c0_24 = arith.constant 0 : index
    %c0_25 = arith.constant 0 : index
    %69 = vector.load %arg2[%c0_24, %c0_25] : memref<1x512xf32, #tpu.memory_space<vmem>>, vector<1x512xf32>
    %70 = vector.broadcast %69 : vector<1x512xf32> to vector<8x512xf32>
    %71 = arith.addf %68, %70 : vector<8x512xf32>
    %72 = arith.truncf %61 : vector<8x128xf32> to vector<8x128xbf16>
    %c0_26 = arith.constant 0 : index
    %c0_27 = arith.constant 0 : index
    %73 = vector.load %arg3[%c0_26, %c0_27] : memref<128x512xbf16, #tpu.memory_space<vmem>>, vector<128x512xbf16>
    %cst_28 = arith.constant dense<0.000000e+00> : vector<8x512xf32>
    %74 = tpu.matmul %72, %73, %cst_28 {dimension_numbers = #tpu.dot_dimension_numbers<[1], [0], [0], [1], [0, 0, 1, 1], [], []>} : vector<8x128xbf16>, vector<128x512xbf16>, vector<8x512xf32> -> vector<8x512xf32>
    %75 = arith.addf %71, %74 : vector<8x512xf32>
    %76 = vector.extract_strided_slice %75 {offsets = [0, 0], sizes = [8, 384], strides = [1, 1]} : vector<8x512xf32> to vector<8x384xf32>
    %77 = arith.negf %76 : vector<8x384xf32>
    %78 = math.exp %77 : vector<8x384xf32>
    %cst_29 = arith.constant 1.000000e+00 : f32
    %79 = vector.broadcast %cst_29 : f32 to vector<8x384xf32>
    %80 = arith.addf %79, %78 : vector<8x384xf32>
    %81 = arith.divf %79, %80 : vector<8x384xf32>
    %82 = vector.extract_strided_slice %75 {offsets = [0, 384], sizes = [8, 128], strides = [1, 1]} : vector<8x512xf32> to vector<8x128xf32>
    %83 = math.tanh %82 : vector<8x128xf32>
    %84 = vector.extract_strided_slice %81 {offsets = [0, 0], sizes = [8, 128], strides = [1, 1]} : vector<8x384xf32> to vector<8x128xf32>
    %85 = vector.extract_strided_slice %81 {offsets = [0, 128], sizes = [8, 128], strides = [1, 1]} : vector<8x384xf32> to vector<8x128xf32>
    %86 = vector.extract_strided_slice %81 {offsets = [0, 256], sizes = [8, 128], strides = [1, 1]} : vector<8x384xf32> to vector<8x128xf32>
    %87 = arith.mulf %85, %59 : vector<8x128xf32>
    %88 = arith.mulf %84, %83 : vector<8x128xf32>
    %89 = arith.addf %87, %88 : vector<8x128xf32>
    %90 = math.tanh %89 : vector<8x128xf32>
    %91 = arith.mulf %86, %90 : vector<8x128xf32>
    %c3_i32 = arith.constant 3 : i32
    %92 = arith.index_cast %c3_i32 : i32 to index
    %c0_30 = arith.constant 0 : index
    %c0_31 = arith.constant 0 : index
    %93 = vector.load %arg0[%92, %c0_30, %c0_31] : memref<8x8x1xf32, #tpu.memory_space<vmem>>, vector<1x8x1xf32>
    %94 = vector.shape_cast %93 : vector<1x8x1xf32> to vector<8x1xf32>
    %c0_32 = arith.constant 0 : index
    %c0_33 = arith.constant 0 : index
    %95 = vector.load %arg1[%c0_32, %c0_33] : memref<1x512xf32, #tpu.memory_space<vmem>>, vector<1x512xf32>
    %96 = vector.broadcast %94 : vector<8x1xf32> to vector<8x512xf32>
    %97 = vector.broadcast %95 : vector<1x512xf32> to vector<8x512xf32>
    %98 = arith.mulf %96, %97 : vector<8x512xf32>
    %c0_34 = arith.constant 0 : index
    %c0_35 = arith.constant 0 : index
    %99 = vector.load %arg2[%c0_34, %c0_35] : memref<1x512xf32, #tpu.memory_space<vmem>>, vector<1x512xf32>
    %100 = vector.broadcast %99 : vector<1x512xf32> to vector<8x512xf32>
    %101 = arith.addf %98, %100 : vector<8x512xf32>
    %102 = arith.truncf %91 : vector<8x128xf32> to vector<8x128xbf16>
    %c0_36 = arith.constant 0 : index
    %c0_37 = arith.constant 0 : index
    %103 = vector.load %arg3[%c0_36, %c0_37] : memref<128x512xbf16, #tpu.memory_space<vmem>>, vector<128x512xbf16>
    %cst_38 = arith.constant dense<0.000000e+00> : vector<8x512xf32>
    %104 = tpu.matmul %102, %103, %cst_38 {dimension_numbers = #tpu.dot_dimension_numbers<[1], [0], [0], [1], [0, 0, 1, 1], [], []>} : vector<8x128xbf16>, vector<128x512xbf16>, vector<8x512xf32> -> vector<8x512xf32>
    %105 = arith.addf %101, %104 : vector<8x512xf32>
    %106 = vector.extract_strided_slice %105 {offsets = [0, 0], sizes = [8, 384], strides = [1, 1]} : vector<8x512xf32> to vector<8x384xf32>
    %107 = arith.negf %106 : vector<8x384xf32>
    %108 = math.exp %107 : vector<8x384xf32>
    %cst_39 = arith.constant 1.000000e+00 : f32
    %109 = vector.broadcast %cst_39 : f32 to vector<8x384xf32>
    %110 = arith.addf %109, %108 : vector<8x384xf32>
    %111 = arith.divf %109, %110 : vector<8x384xf32>
    %112 = vector.extract_strided_slice %105 {offsets = [0, 384], sizes = [8, 128], strides = [1, 1]} : vector<8x512xf32> to vector<8x128xf32>
    %113 = math.tanh %112 : vector<8x128xf32>
    %114 = vector.extract_strided_slice %111 {offsets = [0, 0], sizes = [8, 128], strides = [1, 1]} : vector<8x384xf32> to vector<8x128xf32>
    %115 = vector.extract_strided_slice %111 {offsets = [0, 128], sizes = [8, 128], strides = [1, 1]} : vector<8x384xf32> to vector<8x128xf32>
    %116 = vector.extract_strided_slice %111 {offsets = [0, 256], sizes = [8, 128], strides = [1, 1]} : vector<8x384xf32> to vector<8x128xf32>
    %117 = arith.mulf %115, %89 : vector<8x128xf32>
    %118 = arith.mulf %114, %113 : vector<8x128xf32>
    %119 = arith.addf %117, %118 : vector<8x128xf32>
    %120 = math.tanh %119 : vector<8x128xf32>
    %121 = arith.mulf %116, %120 : vector<8x128xf32>
    %c4_i32 = arith.constant 4 : i32
    %122 = arith.index_cast %c4_i32 : i32 to index
    %c0_40 = arith.constant 0 : index
    %c0_41 = arith.constant 0 : index
    %123 = vector.load %arg0[%122, %c0_40, %c0_41] : memref<8x8x1xf32, #tpu.memory_space<vmem>>, vector<1x8x1xf32>
    %124 = vector.shape_cast %123 : vector<1x8x1xf32> to vector<8x1xf32>
    %c0_42 = arith.constant 0 : index
    %c0_43 = arith.constant 0 : index
    %125 = vector.load %arg1[%c0_42, %c0_43] : memref<1x512xf32, #tpu.memory_space<vmem>>, vector<1x512xf32>
    %126 = vector.broadcast %124 : vector<8x1xf32> to vector<8x512xf32>
    %127 = vector.broadcast %125 : vector<1x512xf32> to vector<8x512xf32>
    %128 = arith.mulf %126, %127 : vector<8x512xf32>
    %c0_44 = arith.constant 0 : index
    %c0_45 = arith.constant 0 : index
    %129 = vector.load %arg2[%c0_44, %c0_45] : memref<1x512xf32, #tpu.memory_space<vmem>>, vector<1x512xf32>
    %130 = vector.broadcast %129 : vector<1x512xf32> to vector<8x512xf32>
    %131 = arith.addf %128, %130 : vector<8x512xf32>
    %132 = arith.truncf %121 : vector<8x128xf32> to vector<8x128xbf16>
    %c0_46 = arith.constant 0 : index
    %c0_47 = arith.constant 0 : index
    %133 = vector.load %arg3[%c0_46, %c0_47] : memref<128x512xbf16, #tpu.memory_space<vmem>>, vector<128x512xbf16>
    %cst_48 = arith.constant dense<0.000000e+00> : vector<8x512xf32>
    %134 = tpu.matmul %132, %133, %cst_48 {dimension_numbers = #tpu.dot_dimension_numbers<[1], [0], [0], [1], [0, 0, 1, 1], [], []>} : vector<8x128xbf16>, vector<128x512xbf16>, vector<8x512xf32> -> vector<8x512xf32>
    %135 = arith.addf %131, %134 : vector<8x512xf32>
    %136 = vector.extract_strided_slice %135 {offsets = [0, 0], sizes = [8, 384], strides = [1, 1]} : vector<8x512xf32> to vector<8x384xf32>
    %137 = arith.negf %136 : vector<8x384xf32>
    %138 = math.exp %137 : vector<8x384xf32>
    %cst_49 = arith.constant 1.000000e+00 : f32
    %139 = vector.broadcast %cst_49 : f32 to vector<8x384xf32>
    %140 = arith.addf %139, %138 : vector<8x384xf32>
    %141 = arith.divf %139, %140 : vector<8x384xf32>
    %142 = vector.extract_strided_slice %135 {offsets = [0, 384], sizes = [8, 128], strides = [1, 1]} : vector<8x512xf32> to vector<8x128xf32>
    %143 = math.tanh %142 : vector<8x128xf32>
    %144 = vector.extract_strided_slice %141 {offsets = [0, 0], sizes = [8, 128], strides = [1, 1]} : vector<8x384xf32> to vector<8x128xf32>
    %145 = vector.extract_strided_slice %141 {offsets = [0, 128], sizes = [8, 128], strides = [1, 1]} : vector<8x384xf32> to vector<8x128xf32>
    %146 = vector.extract_strided_slice %141 {offsets = [0, 256], sizes = [8, 128], strides = [1, 1]} : vector<8x384xf32> to vector<8x128xf32>
    %147 = arith.mulf %145, %119 : vector<8x128xf32>
    %148 = arith.mulf %144, %143 : vector<8x128xf32>
    %149 = arith.addf %147, %148 : vector<8x128xf32>
    %150 = math.tanh %149 : vector<8x128xf32>
    %151 = arith.mulf %146, %150 : vector<8x128xf32>
    %c5_i32 = arith.constant 5 : i32
    %152 = arith.index_cast %c5_i32 : i32 to index
    %c0_50 = arith.constant 0 : index
    %c0_51 = arith.constant 0 : index
    %153 = vector.load %arg0[%152, %c0_50, %c0_51] : memref<8x8x1xf32, #tpu.memory_space<vmem>>, vector<1x8x1xf32>
    %154 = vector.shape_cast %153 : vector<1x8x1xf32> to vector<8x1xf32>
    %c0_52 = arith.constant 0 : index
    %c0_53 = arith.constant 0 : index
    %155 = vector.load %arg1[%c0_52, %c0_53] : memref<1x512xf32, #tpu.memory_space<vmem>>, vector<1x512xf32>
    %156 = vector.broadcast %154 : vector<8x1xf32> to vector<8x512xf32>
    %157 = vector.broadcast %155 : vector<1x512xf32> to vector<8x512xf32>
    %158 = arith.mulf %156, %157 : vector<8x512xf32>
    %c0_54 = arith.constant 0 : index
    %c0_55 = arith.constant 0 : index
    %159 = vector.load %arg2[%c0_54, %c0_55] : memref<1x512xf32, #tpu.memory_space<vmem>>, vector<1x512xf32>
    %160 = vector.broadcast %159 : vector<1x512xf32> to vector<8x512xf32>
    %161 = arith.addf %158, %160 : vector<8x512xf32>
    %162 = arith.truncf %151 : vector<8x128xf32> to vector<8x128xbf16>
    %c0_56 = arith.constant 0 : index
    %c0_57 = arith.constant 0 : index
    %163 = vector.load %arg3[%c0_56, %c0_57] : memref<128x512xbf16, #tpu.memory_space<vmem>>, vector<128x512xbf16>
    %cst_58 = arith.constant dense<0.000000e+00> : vector<8x512xf32>
    %164 = tpu.matmul %162, %163, %cst_58 {dimension_numbers = #tpu.dot_dimension_numbers<[1], [0], [0], [1], [0, 0, 1, 1], [], []>} : vector<8x128xbf16>, vector<128x512xbf16>, vector<8x512xf32> -> vector<8x512xf32>
    %165 = arith.addf %161, %164 : vector<8x512xf32>
    %166 = vector.extract_strided_slice %165 {offsets = [0, 0], sizes = [8, 384], strides = [1, 1]} : vector<8x512xf32> to vector<8x384xf32>
    %167 = arith.negf %166 : vector<8x384xf32>
    %168 = math.exp %167 : vector<8x384xf32>
    %cst_59 = arith.constant 1.000000e+00 : f32
    %169 = vector.broadcast %cst_59 : f32 to vector<8x384xf32>
    %170 = arith.addf %169, %168 : vector<8x384xf32>
    %171 = arith.divf %169, %170 : vector<8x384xf32>
    %172 = vector.extract_strided_slice %165 {offsets = [0, 384], sizes = [8, 128], strides = [1, 1]} : vector<8x512xf32> to vector<8x128xf32>
    %173 = math.tanh %172 : vector<8x128xf32>
    %174 = vector.extract_strided_slice %171 {offsets = [0, 0], sizes = [8, 128], strides = [1, 1]} : vector<8x384xf32> to vector<8x128xf32>
    %175 = vector.extract_strided_slice %171 {offsets = [0, 128], sizes = [8, 128], strides = [1, 1]} : vector<8x384xf32> to vector<8x128xf32>
    %176 = vector.extract_strided_slice %171 {offsets = [0, 256], sizes = [8, 128], strides = [1, 1]} : vector<8x384xf32> to vector<8x128xf32>
    %177 = arith.mulf %175, %149 : vector<8x128xf32>
    %178 = arith.mulf %174, %173 : vector<8x128xf32>
    %179 = arith.addf %177, %178 : vector<8x128xf32>
    %180 = math.tanh %179 : vector<8x128xf32>
    %181 = arith.mulf %176, %180 : vector<8x128xf32>
    %c6_i32 = arith.constant 6 : i32
    %182 = arith.index_cast %c6_i32 : i32 to index
    %c0_60 = arith.constant 0 : index
    %c0_61 = arith.constant 0 : index
    %183 = vector.load %arg0[%182, %c0_60, %c0_61] : memref<8x8x1xf32, #tpu.memory_space<vmem>>, vector<1x8x1xf32>
    %184 = vector.shape_cast %183 : vector<1x8x1xf32> to vector<8x1xf32>
    %c0_62 = arith.constant 0 : index
    %c0_63 = arith.constant 0 : index
    %185 = vector.load %arg1[%c0_62, %c0_63] : memref<1x512xf32, #tpu.memory_space<vmem>>, vector<1x512xf32>
    %186 = vector.broadcast %184 : vector<8x1xf32> to vector<8x512xf32>
    %187 = vector.broadcast %185 : vector<1x512xf32> to vector<8x512xf32>
    %188 = arith.mulf %186, %187 : vector<8x512xf32>
    %c0_64 = arith.constant 0 : index
    %c0_65 = arith.constant 0 : index
    %189 = vector.load %arg2[%c0_64, %c0_65] : memref<1x512xf32, #tpu.memory_space<vmem>>, vector<1x512xf32>
    %190 = vector.broadcast %189 : vector<1x512xf32> to vector<8x512xf32>
    %191 = arith.addf %188, %190 : vector<8x512xf32>
    %192 = arith.truncf %181 : vector<8x128xf32> to vector<8x128xbf16>
    %c0_66 = arith.constant 0 : index
    %c0_67 = arith.constant 0 : index
    %193 = vector.load %arg3[%c0_66, %c0_67] : memref<128x512xbf16, #tpu.memory_space<vmem>>, vector<128x512xbf16>
    %cst_68 = arith.constant dense<0.000000e+00> : vector<8x512xf32>
    %194 = tpu.matmul %192, %193, %cst_68 {dimension_numbers = #tpu.dot_dimension_numbers<[1], [0], [0], [1], [0, 0, 1, 1], [], []>} : vector<8x128xbf16>, vector<128x512xbf16>, vector<8x512xf32> -> vector<8x512xf32>
    %195 = arith.addf %191, %194 : vector<8x512xf32>
    %196 = vector.extract_strided_slice %195 {offsets = [0, 0], sizes = [8, 384], strides = [1, 1]} : vector<8x512xf32> to vector<8x384xf32>
    %197 = arith.negf %196 : vector<8x384xf32>
    %198 = math.exp %197 : vector<8x384xf32>
    %cst_69 = arith.constant 1.000000e+00 : f32
    %199 = vector.broadcast %cst_69 : f32 to vector<8x384xf32>
    %200 = arith.addf %199, %198 : vector<8x384xf32>
    %201 = arith.divf %199, %200 : vector<8x384xf32>
    %202 = vector.extract_strided_slice %195 {offsets = [0, 384], sizes = [8, 128], strides = [1, 1]} : vector<8x512xf32> to vector<8x128xf32>
    %203 = math.tanh %202 : vector<8x128xf32>
    %204 = vector.extract_strided_slice %201 {offsets = [0, 0], sizes = [8, 128], strides = [1, 1]} : vector<8x384xf32> to vector<8x128xf32>
    %205 = vector.extract_strided_slice %201 {offsets = [0, 128], sizes = [8, 128], strides = [1, 1]} : vector<8x384xf32> to vector<8x128xf32>
    %206 = vector.extract_strided_slice %201 {offsets = [0, 256], sizes = [8, 128], strides = [1, 1]} : vector<8x384xf32> to vector<8x128xf32>
    %207 = arith.mulf %205, %179 : vector<8x128xf32>
    %208 = arith.mulf %204, %203 : vector<8x128xf32>
    %209 = arith.addf %207, %208 : vector<8x128xf32>
    %210 = math.tanh %209 : vector<8x128xf32>
    %211 = arith.mulf %206, %210 : vector<8x128xf32>
    %c7_i32 = arith.constant 7 : i32
    %212 = arith.index_cast %c7_i32 : i32 to index
    %c0_70 = arith.constant 0 : index
    %c0_71 = arith.constant 0 : index
    %213 = vector.load %arg0[%212, %c0_70, %c0_71] : memref<8x8x1xf32, #tpu.memory_space<vmem>>, vector<1x8x1xf32>
    %214 = vector.shape_cast %213 : vector<1x8x1xf32> to vector<8x1xf32>
    %c0_72 = arith.constant 0 : index
    %c0_73 = arith.constant 0 : index
    %215 = vector.load %arg1[%c0_72, %c0_73] : memref<1x512xf32, #tpu.memory_space<vmem>>, vector<1x512xf32>
    %216 = vector.broadcast %214 : vector<8x1xf32> to vector<8x512xf32>
    %217 = vector.broadcast %215 : vector<1x512xf32> to vector<8x512xf32>
    %218 = arith.mulf %216, %217 : vector<8x512xf32>
    %c0_74 = arith.constant 0 : index
    %c0_75 = arith.constant 0 : index
    %219 = vector.load %arg2[%c0_74, %c0_75] : memref<1x512xf32, #tpu.memory_space<vmem>>, vector<1x512xf32>
    %220 = vector.broadcast %219 : vector<1x512xf32> to vector<8x512xf32>
    %221 = arith.addf %218, %220 : vector<8x512xf32>
    %222 = arith.truncf %211 : vector<8x128xf32> to vector<8x128xbf16>
    %c0_76 = arith.constant 0 : index
    %c0_77 = arith.constant 0 : index
    %223 = vector.load %arg3[%c0_76, %c0_77] : memref<128x512xbf16, #tpu.memory_space<vmem>>, vector<128x512xbf16>
    %cst_78 = arith.constant dense<0.000000e+00> : vector<8x512xf32>
    %224 = tpu.matmul %222, %223, %cst_78 {dimension_numbers = #tpu.dot_dimension_numbers<[1], [0], [0], [1], [0, 0, 1, 1], [], []>} : vector<8x128xbf16>, vector<128x512xbf16>, vector<8x512xf32> -> vector<8x512xf32>
    %225 = arith.addf %221, %224 : vector<8x512xf32>
    %226 = vector.extract_strided_slice %225 {offsets = [0, 0], sizes = [8, 384], strides = [1, 1]} : vector<8x512xf32> to vector<8x384xf32>
    %227 = arith.negf %226 : vector<8x384xf32>
    %228 = math.exp %227 : vector<8x384xf32>
    %cst_79 = arith.constant 1.000000e+00 : f32
    %229 = vector.broadcast %cst_79 : f32 to vector<8x384xf32>
    %230 = arith.addf %229, %228 : vector<8x384xf32>
    %231 = arith.divf %229, %230 : vector<8x384xf32>
    %232 = vector.extract_strided_slice %225 {offsets = [0, 384], sizes = [8, 128], strides = [1, 1]} : vector<8x512xf32> to vector<8x128xf32>
    %233 = math.tanh %232 : vector<8x128xf32>
    %234 = vector.extract_strided_slice %231 {offsets = [0, 0], sizes = [8, 128], strides = [1, 1]} : vector<8x384xf32> to vector<8x128xf32>
    %235 = vector.extract_strided_slice %231 {offsets = [0, 128], sizes = [8, 128], strides = [1, 1]} : vector<8x384xf32> to vector<8x128xf32>
    %236 = vector.extract_strided_slice %231 {offsets = [0, 256], sizes = [8, 128], strides = [1, 1]} : vector<8x384xf32> to vector<8x128xf32>
    %237 = arith.mulf %235, %209 : vector<8x128xf32>
    %238 = arith.mulf %234, %233 : vector<8x128xf32>
    %239 = arith.addf %237, %238 : vector<8x128xf32>
    %240 = math.tanh %239 : vector<8x128xf32>
    %241 = arith.mulf %236, %240 : vector<8x128xf32>
    %c8_i32 = arith.constant 8 : i32
    %c0_80 = arith.constant 0 : index
    %c0_81 = arith.constant 0 : index
    %242 = vector.load %arg4[%c0_80, %c0_81] : memref<128x128xf32, #tpu.memory_space<vmem>>, vector<128x128xf32>
    %cst_82 = arith.constant dense<0.000000e+00> : vector<8x128xf32>
    %243 = tpu.matmul %241, %242, %cst_82 {dimension_numbers = #tpu.dot_dimension_numbers<[1], [0], [0], [1], [0, 0, 1, 1], [], []>} : vector<8x128xf32>, vector<128x128xf32>, vector<8x128xf32> -> vector<8x128xf32>
    %c0_83 = arith.constant 0 : index
    %c0_84 = arith.constant 0 : index
    %244 = vector.load %arg5[%c0_83, %c0_84] : memref<1x128xf32, #tpu.memory_space<vmem>>, vector<1x128xf32>
    %245 = vector.broadcast %244 : vector<1x128xf32> to vector<8x128xf32>
    %246 = arith.addf %243, %245 : vector<8x128xf32>
    %c0_85 = arith.constant 0 : index
    %c0_86 = arith.constant 0 : index
    %247 = vector.load %arg6[%c0_85, %c0_86] : memref<8x128xf32, #tpu.memory_space<vmem>>, vector<8x128xf32>
    tpu.vector_store %arg6[%c0_85, %c0_86], %246 {strides = array<i32>} : memref<8x128xf32, #tpu.memory_space<vmem>>, vector<8x128xf32>,
    return
  }
}

</mosaic_0001>

<bundles_post_ra>
// kernel: weather_rnn_forward.1
= control target key start
LH: loop header
LB: loop body
LE: loop exit
PB: predicated region body
PF: predicated region fallthrough
CT: control target
= control target key end

     0   :  { %11 = vsyncpa [#allocation3], 0  ;;  %s2294_s0 = inlined_call_operand.vmem [shape: f32[8,8,1], index: 0, kind: input, shape index: {}]   ;;  %s2295_s1 = inlined_call_operand.vmem [shape: f32[1,512], index: 1, kind: input, shape index: {}]   ;;  %s2296_s2 = inlined_call_operand.vmem [shape: f32[1,512], index: 2, kind: input, shape index: {}]   ;;  %s2297_s3 = inlined_call_operand.hbm [shape: bf16[128,512], index: 3, kind: input, shape index: {}]   ;;  %s2298_s4 = inlined_call_operand.hbm [shape: f32[128,128], index: 4, kind: input, shape index: {}]   ;;  %s2299_s5 = inlined_call_operand.vmem [shape: f32[1,128], index: 5, kind: input, shape index: {}]   ;;  %s2300_s6 = inlined_call_operand.vmem [shape: f32[8,128], index: 6, kind: output, shape index: {}]  }
   0x1   :  { %s23_s23 = sshll.u32 %s2297_s3, 4  ;;  %s24_s23 = int_to_ptr.hbm [resolvable:$true] %s23_s23 }
   0x2   :  { %12 = vsyncpa [#allocation5], 0  ;;  %s1775_s24 = smov [#allocation2]   ;;  %s36_s28 = sshll.u32 %s2298_s4, 4  ;;  %s37_s28 = int_to_ptr.hbm [resolvable:$true] %s36_s28 }
   0x3   :  { %s25_s25 = sshll.u32 %s1775_s24, 4  ;;  %s1776_s29 = smov 256   ;;  %s26_s25 = int_to_ptr.vmem [resolvable:$true] %s25_s25 }
   0x4   :  { %s1777_s30 = smov 16   ;;  %s1778_s7 = smov [#allocation4]  }
   0x5   :  { %31 = dma.hbm_to_vmem [thread:$0]  %s24_s23, 4096, %s26_s25, [#allocation3], %s1776_s29, %s1776_s29, %s1777_s30  }
   0x6   :  { %s38_s8 = sshll.u32 %s1778_s7, 4  ;;  %s1779_s9 = smov 128   ;;  %s39_s8 = int_to_ptr.vmem [resolvable:$true] %s38_s8 }
   0x7   :  { %s1780_s10 = smov 8  }
   0x8   :  { %44 = dma.hbm_to_vmem [thread:$0]  %s37_s28, 2048, %s39_s8, [#allocation5], %s1779_s9, %s1779_s9, %s1780_s10  }
   0x9   :  { %1771 = dma.done.wait [#allocation3], 4096  }
   0xa   :  { %1772 = vsyncadd [#allocation3], 4294963200 }
   0xb   :  { %1773 = dma.done.wait [#allocation5], 2048  }
   0xc   :  { %1774 = vsyncadd [#allocation5], 4294965248  ;;  %v1781_v0 = vmov 0   ;;  %v1507_v1 = vld [vmem:[#allocation2 + $0xe0] sm:$0xf] }
   0xd   :  { %1591 = vset.pattern.permute.xlu0 %v1781_v0  ;;  %1592 = vset.pattern.permute.xlu1 %v1781_v0  ;;  %v1582_v2 = vld [vmem:[#allocation2 + $0xec] sm:$0xf0]  ;;  %v1580_v3 = vld [vmem:[#allocation2 + $0xe4] sm:$0xf]  ;;  %v1509_v5 = vld [vmem:[#allocation2 + $0xf0] sm:$0xf0] }
   0xe   :  { %1593 = vset.pattern.permute.xlu2 %v1781_v0  ;;  %v1826_v4 = vor.u32 %v1582_v2, %v1507_v1  ;;  %v1515_v6 = vld [vmem:[#allocation2 + $0xe8] sm:$0xf]  ;;  %v1583_v7 = vld [vmem:[#allocation2 + $0xf4] sm:$0xf0]  ;;  %v1828_v8 = vor.u32 %v1580_v3, %v1509_v5  ;;  %v1581_v10 = vld [vmem:[#allocation2 + $0xec] sm:$0xf] }
   0xf   :  { %v1830_v9 = vor.u32 %v1583_v7, %v1515_v6  ;;  %v1517_v11 = vld [vmem:[#allocation2 + $0xf8] sm:$0xf0]  ;;  %v1491_v12 = vld [vmem:[#allocation2 + $0xc0] sm:$0xf]  ;;  %v1578_v14 = vld [vmem:[#allocation2 + $0xcc] sm:$0xf0] }
  0x10   :  { %282 = vmatpush.bf16.msra.mxu0 %v1826_v4  ;;  %v1833_v13 = vor.u32 %v1581_v10, %v1517_v11  ;;  %v1576_v15 = vld [vmem:[#allocation2 + $0xc4] sm:$0xf]  ;;  %v1493_v16 = vld [vmem:[#allocation2 + $0xd0] sm:$0xf0]  ;;  %295 = vmatpush.bf16.msra.mxu1 %v1828_v8  ;;  %v1837_v17 = vor.u32 %v1578_v14, %v1491_v12  ;;  %v1499_v19 = vld [vmem:[#allocation2 + $0xc8] sm:$0xf] }
  0x11   :  { %308 = vmatpush.bf16.msra.mxu2 %v1830_v9  ;;  %v1839_v18 = vor.u32 %v1576_v15, %v1493_v16  ;;  %v1579_v20 = vld [vmem:[#allocation2 + $0xd4] sm:$0xf0]  ;;  %v1577_v21 = vld [vmem:[#allocation2 + $0xcc] sm:$0xf]  ;;  %v1501_v23 = vld [vmem:[#allocation2 + $0xd8] sm:$0xf0] }
  0x12   :  { %321 = vmatpush.bf16.msra.mxu3 %v1833_v13  ;;  %v1842_v22 = vor.u32 %v1579_v20, %v1499_v19  ;;  %v1475_v24 = vld [vmem:[#allocation2 + $0xa0] sm:$0xf]  ;;  %v1574_v25 = vld [vmem:[#allocation2 + $0xac] sm:$0xf0]  ;;  %v1844_v26 = vor.u32 %v1577_v21, %v1501_v23  ;;  %v1572_v27 = vld [vmem:[#allocation2 + $0xa4] sm:$0xf] }
  0x13   :  { %v1477_v28 = vld [vmem:[#allocation2 + $0xb0] sm:$0xf0]  ;;  %v1483_v29 = vld [vmem:[#allocation2 + $0xa8] sm:$0xf]  ;;  %v1847_v30 = vor.u32 %v1574_v25, %v1475_v24  ;;  %v1575_v31 = vld [vmem:[#allocation2 + $0xb4] sm:$0xf0] }
  0x14   :  { %283 = vmatpush.bf16.msra.mxu0 %v1837_v17  ;;  %v1573_v32 = vld [vmem:[#allocation2 + $0xac] sm:$0xf]  ;;  %v1485_v33 = vld [vmem:[#allocation2 + $0xb8] sm:$0xf0]  ;;  %296 = vmatpush.bf16.msra.mxu1 %v1839_v18  ;;  %v1851_v34 = vor.u32 %v1572_v27, %v1477_v28  ;;  %v1853_v35 = vor.u32 %v1575_v31, %v1483_v29  ;;  %v1459_v36 = vld [vmem:[#allocation2 + $0x80] sm:$0xf] }
  0x15   :  { %309 = vmatpush.bf16.msra.mxu2 %v1842_v22  ;;  %v1570_v37 = vld [vmem:[#allocation2 + $0x8c] sm:$0xf0]  ;;  %v1568_v38 = vld [vmem:[#allocation2 + $0x84] sm:$0xf]  ;;  %v1856_v39 = vor.u32 %v1573_v32, %v1485_v33  ;;  %v1461_v40 = vld [vmem:[#allocation2 + $0x90] sm:$0xf0] }
  0x16   :  { %322 = vmatpush.bf16.msra.mxu3 %v1844_v26  ;;  %v1467_v41 = vld [vmem:[#allocation2 + $0x88] sm:$0xf]  ;;  %v1571_v42 = vld [vmem:[#allocation2 + $0x94] sm:$0xf0]  ;;  %v1569_v43 = vld [vmem:[#allocation2 + $0x8c] sm:$0xf]  ;;  %v1859_v45 = vor.u32 %v1570_v37, %v1459_v36  ;;  %v1863_v46 = vor.u32 %v1568_v38, %v1461_v40 }
  0x17   :  { %v1469_v44 = vld [vmem:[#allocation2 + $0x98] sm:$0xf0]  ;;  %v1865_v47 = vor.u32 %v1571_v42, %v1467_v41  ;;  %v1443_v48 = vld [vmem:[#allocation2 + $0x60] sm:$0xf]  ;;  %v1566_v49 = vld [vmem:[#allocation2 + $0x6c] sm:$0xf0] }
  0x18   :  { %284 = vmatpush.bf16.msra.mxu0 %v1847_v30  ;;  %297 = vmatpush.bf16.msra.mxu1 %v1851_v34  ;;  %v1564_v50 = vld [vmem:[#allocation2 + $0x64] sm:$0xf]  ;;  %v1868_v51 = vor.u32 %v1569_v43, %v1469_v44  ;;  %v1445_v52 = vld [vmem:[#allocation2 + $0x70] sm:$0xf0]  ;;  %v1451_v53 = vld [vmem:[#allocation2 + $0x68] sm:$0xf]  ;;  %v1871_v57 = vor.u32 %v1566_v49, %v1443_v48 }
  0x19   :  { %310 = vmatpush.bf16.msra.mxu2 %v1853_v35  ;;  %v1567_v54 = vld [vmem:[#allocation2 + $0x74] sm:$0xf0]  ;;  %v1565_v55 = vld [vmem:[#allocation2 + $0x6c] sm:$0xf]  ;;  %v1453_v56 = vld [vmem:[#allocation2 + $0x78] sm:$0xf0]  ;;  %v1875_v59 = vor.u32 %v1564_v50, %v1445_v52 }
  0x1a   :  { %323 = vmatpush.bf16.msra.mxu3 %v1856_v39  ;;  %v1427_v58 = vld [vmem:[#allocation2 + $0x40] sm:$0xf]  ;;  %v1877_v60 = vor.u32 %v1567_v54, %v1451_v53  ;;  %v1562_v61 = vld [vmem:[#allocation2 + $0x4c] sm:$0xf0]  ;;  %v1560_v62 = vld [vmem:[#allocation2 + $0x44] sm:$0xf]  ;;  %v1883_v1 = vor.u32 %v1565_v55, %v1453_v56 }
  0x1b   :  { %v56_v63 = vld [vmem:[%s2294_s0] sm:$0xff]  ;;  %v1429_v2 = vld [vmem:[#allocation2 + $0x50] sm:$0xf0]  ;;  %v1435_v3 = vld [vmem:[#allocation2 + $0x48] sm:$0xf]  ;;  %v1886_v10 = vor.u32 %v1562_v61, %v1427_v58 }
  0x1c   :  { %285 = vmatpush.bf16.msra.mxu0 %v1859_v45  ;;  %298 = vmatpush.bf16.msra.mxu1 %v1863_v46  ;;  %v1563_v5 = vld [vmem:[#allocation2 + $0x54] sm:$0xf0]  ;;  %v1561_v6 = vld [vmem:[#allocation2 + $0x4c] sm:$0xf]  ;;  %v1437_v7 = vld [vmem:[#allocation2 + $0x58] sm:$0xf0]  ;;  %v1890_v12 = vor.u32 %v1560_v62, %v1429_v2 }
  0x1d   :  { %311 = vmatpush.bf16.msra.mxu2 %v1865_v47  ;;  %60 = vperm.xlu0 %1591, %v56_v63   ;;  %v1411_v11 = vld [vmem:[#allocation2 + $0x20] sm:$0xf]  ;;  %v1892_v14 = vor.u32 %v1563_v5, %v1435_v3  ;;  %v1558_v15 = vld [vmem:[#allocation2 + $0x2c] sm:$0xf0]  ;;  %v1556_v16 = vld [vmem:[#allocation2 + $0x24] sm:$0xf]  ;;  %v1895_v20 = vor.u32 %v1561_v6, %v1437_v7 }
  0x1e   :  { %324 = vmatpush.bf16.msra.mxu3 %v1868_v51  ;;  %v1413_v19 = vld [vmem:[#allocation2 + $0x30] sm:$0xf0]  ;;  %v1419_v21 = vld [vmem:[#allocation2 + $0x28] sm:$0xf]  ;;  %v1559_v23 = vld [vmem:[#allocation2 + $0x34] sm:$0xf0]  ;;  %v1901_v28 = vor.u32 %v1558_v15, %v1411_v11 }
  0x1f   :  { %v1557_v24 = vld [vmem:[#allocation2 + $0x2c] sm:$0xf]  ;;  %v1421_v25 = vld [vmem:[#allocation2 + $0x38] sm:$0xf0]  ;;  %v1905_v29 = vor.u32 %v1556_v16, %v1413_v19  ;;  %v1907_v31 = vor.u32 %v1559_v23, %v1419_v21  ;;  %v1395_v32 = vld [vmem:[#allocation2] sm:$0xf] }
  0x20   :  { %286 = vmatpush.bf16.msra.mxu0 %v1871_v57  ;;  %299 = vmatpush.bf16.msra.mxu1 %v1875_v59  ;;  %v1524_v27 = vld [vmem:[%s2294_s0 + $0x8] sm:$0xff]  ;;  %v1554_v33 = vld [vmem:[#allocation2 + $0xc] sm:$0xf0]  ;;  %v1552_v36 = vld [vmem:[#allocation2 + $0x4] sm:$0xf]  ;;  %v1910_v37 = vor.u32 %v1557_v24, %v1421_v25 }
  0x21   :  { %312 = vmatpush.bf16.msra.mxu2 %v1877_v60  ;;  %v1397_v38 = vld [vmem:[#allocation2 + $0x10] sm:$0xf0]  ;;  %v1403_v40 = vld [vmem:[#allocation2 + $0x8] sm:$0xf]  ;;  %v1555_v41 = vld [vmem:[#allocation2 + $0x14] sm:$0xf0]  ;;  %v1913_v44 = vor.u32 %v1554_v33, %v1395_v32 }
  0x22   :  { %325 = vmatpush.bf16.msra.mxu3 %v1883_v1  ;;  %v1553_v42 = vld [vmem:[#allocation2 + $0xc] sm:$0xf]  ;;  %v1405_v43 = vld [vmem:[#allocation2 + $0x18] sm:$0xf0]  ;;  %v1917_v48 = vor.u32 %v1552_v36, %v1397_v38  ;;  %v1919_v49 = vor.u32 %v1555_v41, %v1403_v40  ;;  %v1544_v52 = vld [vmem:[%s2294_s0 + $0x30] sm:$0xff] }
  0x23   :  { %v1922_v50 = vor.u32 %v1553_v42, %v1405_v43  ;;  %v76_v55 = vld [vmem:[%s2296_s2] sm:$0xf] }
  0x24   :  { %287 = vmatpush.bf16.msra.mxu0 %v1886_v10  ;;  %300 = vmatpush.bf16.msra.mxu1 %v1890_v12  ;;  %v2010_v61 = vperm.slane %v76_v55, 0  ;;  %v2013_v63 = vperm.slane %v76_v55, 1  ;;  %v2020_v19 = vperm.slane %v76_v55, 2 }
  0x25   :  { %313 = vmatpush.bf16.msra.mxu2 %v1892_v14  ;;  %405 = vperm.xlu0 %1591, %v1524_v27  }
  0x26   :  { %326 = vmatpush.bf16.msra.mxu3 %v1895_v20 }
  0x28   :  { %288 = vmatpush.bf16.msra.mxu0 %v1901_v28  ;;  %301 = vmatpush.bf16.msra.mxu1 %v1905_v29 }
  0x29   :  { %314 = vmatpush.bf16.msra.mxu2 %v1907_v31 }
  0x2a   :  { %327 = vmatpush.bf16.msra.mxu3 %v1910_v37 }
  0x2c   :  { %289 = vmatpush.bf16.msra.mxu0 %v1913_v44  ;;  %302 = vmatpush.bf16.msra.mxu1 %v1917_v48 }
  0x2d   :  { %315 = vmatpush.bf16.msra.mxu2 %v1919_v49  ;;  %1080 = vperm.xlu0 %1591, %v1544_v52  }
  0x2e   :  { %328 = vmatpush.bf16.msra.mxu3 %v1922_v50 }
  0x2f   :  { %290 = vmatmul.bf16.vlgmr.msra.gmra.mxu0 %v1781_v0  ;;  %303 = vmatmul.bf16.vlgmr.msra.gmra.mxu1 %v1781_v0 }
  0x30   :  { %430 = vmatpush.bf16.msrb.mxu1 %v1828_v8  ;;  %316 = vmatmul.bf16.vlgmr.msra.gmra.mxu2 %v1781_v0 }
  0x31   :  { %329 = vmatmul.bf16.vlgmr.msra.gmra.mxu3 %v1781_v0  ;;  %417 = vmatpush.bf16.msrb.mxu0 %v1826_v4  ;;  %v57_v0 = vld [vmem:[%s2295_s1] sm:$0xf] }
  0x32   :  { %443 = vmatpush.bf16.msrb.mxu2 %v1830_v9  ;;  %456 = vmatpush.bf16.msrb.mxu3 %v1833_v13  ;;  %v2002_v53 = vperm.slane %v57_v0, 0  ;;  %v2004_v54 = vperm.slane %v57_v0, 1  ;;  %v2016_v3 = vperm.slane %v57_v0, 2  ;;  %v2023_v38 = vperm.slane %v57_v0, 3 }
  0x34   :  { %431 = vmatpush.bf16.msrb.mxu1 %v1839_v18  ;;  %2305 = vst [vmem:[#allocation8_spill] sm:$0xff] %v2023_v38 }
  0x35   :  { %418 = vmatpush.bf16.msrb.mxu0 %v1837_v17 }
  0x36   :  { %444 = vmatpush.bf16.msrb.mxu2 %v1842_v22  ;;  %457 = vmatpush.bf16.msrb.mxu3 %v1844_v26 }
  0x38   :  { %432 = vmatpush.bf16.msrb.mxu1 %v1851_v34 }
  0x39   :  { %419 = vmatpush.bf16.msrb.mxu0 %v1847_v30 }
  0x3a   :  { %445 = vmatpush.bf16.msrb.mxu2 %v1853_v35  ;;  %458 = vmatpush.bf16.msrb.mxu3 %v1856_v39 }
  0x3c   :  { %433 = vmatpush.bf16.msrb.mxu1 %v1863_v46 }
  0x3d   :  { %420 = vmatpush.bf16.msrb.mxu0 %v1859_v45 }
  0x3e   :  { %446 = vmatpush.bf16.msrb.mxu2 %v1865_v47  ;;  %459 = vmatpush.bf16.msrb.mxu3 %v1868_v51 }
  0x40   :  { %434 = vmatpush.bf16.msrb.mxu1 %v1875_v59 }
  0x41   :  { %421 = vmatpush.bf16.msrb.mxu0 %v1871_v57 }
  0x42   :  { %447 = vmatpush.bf16.msrb.mxu2 %v1877_v60  ;;  %460 = vmatpush.bf16.msrb.mxu3 %v1883_v1 }
  0x44   :  { %435 = vmatpush.bf16.msrb.mxu1 %v1890_v12 }
  0x45   :  { %422 = vmatpush.bf16.msrb.mxu0 %v1886_v10 }
  0x46   :  { %448 = vmatpush.bf16.msrb.mxu2 %v1892_v14  ;;  %461 = vmatpush.bf16.msrb.mxu3 %v1895_v20 }
  0x48   :  { %436 = vmatpush.bf16.msrb.mxu1 %v1905_v29 }
  0x49   :  { %423 = vmatpush.bf16.msrb.mxu0 %v1901_v28 }
  0x4a   :  { %449 = vmatpush.bf16.msrb.mxu2 %v1907_v31  ;;  %462 = vmatpush.bf16.msrb.mxu3 %v1910_v37 }
  0x4c   :  { %437 = vmatpush.bf16.msrb.mxu1 %v1917_v48 }
  0x4d   :  { %424 = vmatpush.bf16.msrb.mxu0 %v1913_v44 }
  0x4e   :  { %450 = vmatpush.bf16.msrb.mxu2 %v1919_v49  ;;  %463 = vmatpush.bf16.msrb.mxu3 %v1922_v50 }
  0x50   :  { %565 = vmatpush.bf16.msra.mxu1 %v1828_v8 }
  0x51   :  { %552 = vmatpush.bf16.msra.mxu0 %v1826_v4 }
  0x52   :  { %578 = vmatpush.bf16.msra.mxu2 %v1830_v9  ;;  %591 = vmatpush.bf16.msra.mxu3 %v1833_v13 }
  0x54   :  { %566 = vmatpush.bf16.msra.mxu1 %v1839_v18 }
  0x55   :  { %553 = vmatpush.bf16.msra.mxu0 %v1837_v17 }
  0x56   :  { %579 = vmatpush.bf16.msra.mxu2 %v1842_v22  ;;  %592 = vmatpush.bf16.msra.mxu3 %v1844_v26 }
  0x58   :  { %567 = vmatpush.bf16.msra.mxu1 %v1851_v34 }
  0x59   :  { %554 = vmatpush.bf16.msra.mxu0 %v1847_v30 }
  0x5a   :  { %580 = vmatpush.bf16.msra.mxu2 %v1853_v35  ;;  %593 = vmatpush.bf16.msra.mxu3 %v1856_v39 }
  0x5c   :  { %568 = vmatpush.bf16.msra.mxu1 %v1863_v46 }
  0x5d   :  { %555 = vmatpush.bf16.msra.mxu0 %v1859_v45 }
  0x5e   :  { %581 = vmatpush.bf16.msra.mxu2 %v1865_v47  ;;  %594 = vmatpush.bf16.msra.mxu3 %v1868_v51 }
  0x60   :  { %569 = vmatpush.bf16.msra.mxu1 %v1875_v59 }
  0x61   :  { %556 = vmatpush.bf16.msra.mxu0 %v1871_v57 }
  0x62   :  { %582 = vmatpush.bf16.msra.mxu2 %v1877_v60  ;;  %595 = vmatpush.bf16.msra.mxu3 %v1883_v1 }
  0x64   :  { %570 = vmatpush.bf16.msra.mxu1 %v1890_v12 }
  0x65   :  { %557 = vmatpush.bf16.msra.mxu0 %v1886_v10 }
  0x66   :  { %583 = vmatpush.bf16.msra.mxu2 %v1892_v14  ;;  %596 = vmatpush.bf16.msra.mxu3 %v1895_v20 }
  0x68   :  { %571 = vmatpush.bf16.msra.mxu1 %v1905_v29 }
  0x69   :  { %558 = vmatpush.bf16.msra.mxu0 %v1901_v28 }
  0x6a   :  { %584 = vmatpush.bf16.msra.mxu2 %v1907_v31  ;;  %597 = vmatpush.bf16.msra.mxu3 %v1910_v37 }
  0x6c   :  { %572 = vmatpush.bf16.msra.mxu1 %v1917_v48 }
  0x6d   :  { %559 = vmatpush.bf16.msra.mxu0 %v1913_v44 }
  0x6e   :  { %585 = vmatpush.bf16.msra.mxu2 %v1919_v49  ;;  %598 = vmatpush.bf16.msra.mxu3 %v1922_v50 }
  0x8f   :  { %v61_v56 = vpop.permute.xlu0 %60 }
  0x90   :  { %v72_v58 = vmul.f32 %v2002_v53, %v61_v56  ;;  %v73_v62 = vmul.f32 %v2004_v54, %v61_v56  ;;  %v74_v16 = vmul.f32 %v2016_v3, %v61_v56 }
  0x92   :  { %v86_v2 = vadd.f32 %v2010_v61, %v72_v58  ;;  %v87_v5 = vadd.f32 %v2013_v63, %v73_v62  ;;  %v88_v24 = vadd.f32 %v2020_v19, %v74_v16  ;;  %v75_v58 = vmul.f32 %v2023_v38, %v61_v56 }
  0x93   :  { %v2026_v62 = vperm.slane %v76_v55, 3 }
  0x95   :  { %2306 = vst [vmem:[#allocation9_spill] sm:$0xff] %v2026_v62 }
  0xac   :  { %v291_v6 = vpop.f32.mrf.mxu0  ;;  %v304_v11 = vpop.f32.mrf.mxu1 }
  0xad   :  { %v334_v7 = vadd.f32 %v291_v6, %v86_v2  ;;  %v335_v15 = vadd.f32 %v304_v11, %v87_v5 }
  0xaf   :  { %v1521_v21 = vmul.f32 -1.442695, %v334_v7  ;;  %v1522_v23 = vmul.f32 -1.442695, %v335_v15  ;;  %v89_v7 = vadd.f32 %v2026_v62, %v75_v58 }
  0xb1   :  { %1595 = vpow2.f32 %v1521_v21 }
  0xb2   :  { %1597 = vpow2.f32 %v1522_v23 }
  0xb3   :  { %v317_v25 = vpop.f32.mrf.mxu2 }
  0xb4   :  { %v336_v27 = vadd.f32 %v317_v25, %v88_v24  ;;  %v330_v32 = vpop.f32.mrf.mxu3  ;;  %v293_v33 = vpop.f32.mrf.mxu0 }
  0xb5   :  { %v306_v36 = vpop.f32.mrf.mxu1  ;;  %v337_v15 = vadd.f32 %v330_v32, %v89_v7 }
  0xb6   :  { %v1523_v40 = vmul.f32 -1.442695, %v336_v27 }
  0xb7   :  { %v1596_v41 = vpop.eup %1595 }
  0xb8   :  { %v1598_v42 = vpop.eup %1597  ;;  %v347_v43 = vadd.f32 1.0, %v1596_v41  ;;  %1599 = vpow2.f32 %v1523_v40 }
  0xb9   :  { %v348_v52 = vadd.f32 1.0, %v1598_v42 }
  0xba   :  { %1601 = vrcp.f32 %v347_v43  ;;  %v361_v27 = vand.u32 2147483648, %v347_v43  ;;  %v359_v33 = vand.u32 2147483647, %v347_v43  ;;  %vm355_vm2 = vweird.f32 %v347_v43 }
  0xbb   :  { %1603 = vrcp.f32 %v348_v52  ;;  %v319_v2 = vpop.f32.mrf.mxu2  ;;  %v376_v56 = vand.u32 2147483648, %v348_v52  ;;  %v374_v40 = vand.u32 2147483647, %v348_v52  ;;  %vm370_vm3 = vweird.f32 %v348_v52 }
  0xbc   :  { %v332_v5 = vpop.f32.mrf.mxu3  ;;  %v362_v58 = vor.u32 1.1754944e-38, %v361_v27  ;;  %vm360_vm5 = vcmp.eq.f32.partialorder %v359_v33, 8.507059e+37 }
  0xbd   :  { %v377_v5 = vor.u32 1.1754944e-38, %v376_v56  ;;  %vm375_vm7 = vcmp.eq.f32.partialorder %v374_v40, 8.507059e+37 }
  0xbe   :  { %v1600_v6 = vpop.eup %1599 }
  0xbf   :  { %v349_v11 = vadd.f32 1.0, %v1600_v6 }
  0xc0   :  { %v1602_v0 = vpop.eup %1601 }
  0xc1   :  { %v1604_v16 = vpop.eup %1603  ;;  %v351_v21 = vmul.f32 %v1602_v0, %v347_v43  ;;  %1605 = vrcp.f32 %v349_v11  ;;  %vm356_vm0 = vweird.f32 %v1602_v0  ;;  %vm385_vm9 = vweird.f32 %v349_v11 }
  0xc2   :  { %v366_v23 = vmul.f32 %v1604_v16, %v348_v52  ;;  %1607 = vtanh.f32 %v337_v15  ;;  %vm371_vm1 = vweird.f32 %v1604_v16  ;;  %vm357_vm4 = vmor %vm355_vm2, %vm356_vm0  ;;  %v391_v52 = vand.u32 2147483648, %v349_v11 }
  0xc3   :  { %v352_v24 = vsub.f32 1.0, %v351_v21  ;;  %vm372_vm6 = vmor %vm370_vm3, %vm371_vm1 }
  0xc4   :  { %v367_v25 = vsub.f32 1.0, %v366_v23  ;;  %v392_v56 = vor.u32 1.1754944e-38, %v391_v52 }
  0xc5   :  { %v353_v55 = vmul.f32 %v1602_v0, %v352_v24 }
  0xc6   :  { %v368_v36 = vmul.f32 %v1604_v16, %v367_v25 }
  0xc7   :  { %v1606_v41 = vpop.eup %1605  ;;  %v354_v42 = vadd.f32 %v1602_v0, %v353_v55 }
  0xc8   :  { %v381_v32 = vmul.f32 %v1606_v41, %v349_v11  ;;  %v369_v2 = vadd.f32 %v1604_v16, %v368_v36  ;;  %v1608_v7 = vpop.eup %1607  ;;  %vm386_vm8 = vweird.f32 %v1606_v41 }
  0xc9   :  { %v358_v6 = vsel %vm357_vm4, %v1602_v0, %v354_v42  ;;  %v389_v0 = vand.u32 2147483647, %v349_v11  ;;  %vm387_vm10 = vmor %vm385_vm9, %vm386_vm8 }
  0xca   :  { %v382_v15 = vsub.f32 1.0, %v381_v32  ;;  %v363_v21 = vsel %vm360_vm5, %v362_v58, %v358_v6  ;;  %v373_v23 = vsel %vm372_vm6, %v1604_v16, %v369_v2 }
  0xcb   :  { %v378_v24 = vsel %vm375_vm7, %v377_v5, %v373_v23  ;;  %v397_v25 = vmul.f32 %v1608_v7, %v363_v21  ;;  %vm390_vm11 = vcmp.eq.f32.partialorder %v389_v0, 8.507059e+37  ;;  %v1528_v21 = vld [vmem:[%s2294_s0 + $0x10] sm:$0xff] }
  0xcc   :  { %v396_v62 = vmul.f32 0.0, %v378_v24  ;;  %v383_v38 = vmul.f32 %v1606_v41, %v382_v15  ;;  %540 = vperm.xlu1 %1592, %v1528_v21  }
  0xce   :  { %v2029_v55 = vadd.f32 %v397_v25, %v396_v62  ;;  %v384_v43 = vadd.f32 %v1606_v41, %v383_v38  ;;  %v406_v38 = vpop.permute.xlu0 %405 }
  0xcf   :  { %v408_v62 = vmul.f32 %v406_v38, %v2002_v53  ;;  %v409_v11 = vmul.f32 %v406_v38, %v2004_v54  ;;  %v410_v6 = vmul.f32 %v406_v38, %v2016_v3 }
  0xd0   :  { %1609 = vtanh.f32 %v2029_v55  ;;  %v388_v27 = vsel %vm387_vm10, %v1606_v41, %v384_v43 }
  0xd1   :  { %v393_v16 = vsel %vm390_vm11, %v392_v56, %v388_v27  ;;  %v412_v41 = vadd.f32 %v408_v62, %v2010_v61  ;;  %v413_v42 = vadd.f32 %v409_v11, %v2013_v63  ;;  %v414_v23 = vadd.f32 %v410_v6, %v2020_v19  ;;  %v1532_v56 = vld [vmem:[%s2294_s0 + $0x18] sm:$0xff]  ;;  %v2307_v62 = vld [vmem:[#allocation8_spill] sm:$0xff] }
  0xd2   :  { %v411_v11 = vmul.f32 %v406_v38, %v2307_v62 }
  0xd4   :  { %675 = vperm.xlu1 %1592, %v1532_v56  }
  0xd6   :  { %v1610_v33 = vpop.eup %1609 }
  0xd7   :  { %v400_v36 = vmul.f32 %v1610_v33, %v393_v16 }
  0xd9   :  { %v416_v40 = vpack.c.bf16 %v400_v36, %v400_v36 }
  0xdb   :  { %425 = vmatmul.bf16.vlgmr.msrb.gmra.mxu0 %v416_v40  ;;  %438 = vmatmul.bf16.vlgmr.msrb.gmra.mxu1 %v416_v40 }
  0xdc   :  { %451 = vmatmul.bf16.vlgmr.msrb.gmra.mxu2 %v416_v40  ;;  %464 = vmatmul.bf16.vlgmr.msrb.gmra.mxu3 %v416_v40 }
  0xdd   :  { %687 = vmatpush.bf16.msrb.mxu0 %v1826_v4  ;;  %700 = vmatpush.bf16.msrb.mxu1 %v1828_v8 }
  0xde   :  { %713 = vmatpush.bf16.msrb.mxu2 %v1830_v9  ;;  %726 = vmatpush.bf16.msrb.mxu3 %v1833_v13 }
  0xe1   :  { %688 = vmatpush.bf16.msrb.mxu0 %v1837_v17  ;;  %701 = vmatpush.bf16.msrb.mxu1 %v1839_v18 }
  0xe2   :  { %714 = vmatpush.bf16.msrb.mxu2 %v1842_v22  ;;  %727 = vmatpush.bf16.msrb.mxu3 %v1844_v26 }
  0xe5   :  { %689 = vmatpush.bf16.msrb.mxu0 %v1847_v30  ;;  %702 = vmatpush.bf16.msrb.mxu1 %v1851_v34 }
  0xe6   :  { %715 = vmatpush.bf16.msrb.mxu2 %v1853_v35  ;;  %728 = vmatpush.bf16.msrb.mxu3 %v1856_v39 }
  0xe9   :  { %690 = vmatpush.bf16.msrb.mxu0 %v1859_v45  ;;  %703 = vmatpush.bf16.msrb.mxu1 %v1863_v46 }
  0xea   :  { %716 = vmatpush.bf16.msrb.mxu2 %v1865_v47  ;;  %729 = vmatpush.bf16.msrb.mxu3 %v1868_v51 }
  0xed   :  { %691 = vmatpush.bf16.msrb.mxu0 %v1871_v57  ;;  %704 = vmatpush.bf16.msrb.mxu1 %v1875_v59 }
  0xee   :  { %717 = vmatpush.bf16.msrb.mxu2 %v1877_v60  ;;  %730 = vmatpush.bf16.msrb.mxu3 %v1883_v1 }
  0xf1   :  { %692 = vmatpush.bf16.msrb.mxu0 %v1886_v10  ;;  %705 = vmatpush.bf16.msrb.mxu1 %v1890_v12 }
  0xf2   :  { %718 = vmatpush.bf16.msrb.mxu2 %v1892_v14  ;;  %731 = vmatpush.bf16.msrb.mxu3 %v1895_v20 }
  0xf5   :  { %693 = vmatpush.bf16.msrb.mxu0 %v1901_v28  ;;  %706 = vmatpush.bf16.msrb.mxu1 %v1905_v29 }
  0xf6   :  { %719 = vmatpush.bf16.msrb.mxu2 %v1907_v31  ;;  %732 = vmatpush.bf16.msrb.mxu3 %v1910_v37 }
  0xf9   :  { %694 = vmatpush.bf16.msrb.mxu0 %v1913_v44  ;;  %707 = vmatpush.bf16.msrb.mxu1 %v1917_v48 }
  0xfa   :  { %720 = vmatpush.bf16.msrb.mxu2 %v1919_v49  ;;  %733 = vmatpush.bf16.msrb.mxu3 %v1922_v50 }
 0x158   :  { %v426_v32 = vpop.f32.mrf.mxu0  ;;  %v439_v58 = vpop.f32.mrf.mxu1 }
 0x159   :  { %v469_v2 = vadd.f32 %v426_v32, %v412_v41  ;;  %v470_v5 = vadd.f32 %v439_v58, %v413_v42  ;;  %v2308_v58 = vld [vmem:[#allocation9_spill] sm:$0xff] }
 0x15b   :  { %v1525_v7 = vmul.f32 -1.442695, %v469_v2  ;;  %v1526_v15 = vmul.f32 -1.442695, %v470_v5  ;;  %v415_v2 = vadd.f32 %v411_v11, %v2308_v58  ;;  %v1548_v5 = vld [vmem:[%s2294_s0 + $0x38] sm:$0xff] }
 0x15c   :  { %1215 = vperm.xlu1 %1592, %v1548_v5  }
 0x15d   :  { %1611 = vpow2.f32 %v1525_v7 }
 0x15e   :  { %1613 = vpow2.f32 %v1526_v15 }
 0x15f   :  { %v452_v24 = vpop.f32.mrf.mxu2  ;;  %v465_v25 = vpop.f32.mrf.mxu3 }
 0x160   :  { %v471_v43 = vadd.f32 %v452_v24, %v414_v23  ;;  %v428_v52 = vpop.f32.mrf.mxu0  ;;  %v441_v0 = vpop.f32.mrf.mxu1  ;;  %v472_v15 = vadd.f32 %v465_v25, %v415_v2 }
 0x162   :  { %v1527_v27 = vmul.f32 -1.442695, %v471_v43 }
 0x163   :  { %v1612_v33 = vpop.eup %1611 }
 0x164   :  { %v1614_v16 = vpop.eup %1613  ;;  %v482_v36 = vadd.f32 1.0, %v1612_v33  ;;  %1615 = vpow2.f32 %v1527_v27 }
 0x165   :  { %v483_v40 = vadd.f32 1.0, %v1614_v16 }
 0x166   :  { %1617 = vrcp.f32 %v482_v36  ;;  %v496_v52 = vand.u32 2147483648, %v482_v36  ;;  %v494_v56 = vand.u32 2147483647, %v482_v36  ;;  %vm490_vm14 = vweird.f32 %v482_v36 }
 0x167   :  { %1619 = vrcp.f32 %v483_v40  ;;  %v454_v41 = vpop.f32.mrf.mxu2  ;;  %v467_v42 = vpop.f32.mrf.mxu3  ;;  %v511_v0 = vand.u32 2147483648, %v483_v40  ;;  %v509_v16 = vand.u32 2147483647, %v483_v40  ;;  %vm505_vm15 = vweird.f32 %v483_v40 }
 0x168   :  { %v497_v42 = vor.u32 1.1754944e-38, %v496_v52  ;;  %vm495_vm2 = vcmp.eq.f32.partialorder %v494_v56, 8.507059e+37 }
 0x169   :  { %v512_v2 = vor.u32 1.1754944e-38, %v511_v0  ;;  %vm510_vm3 = vcmp.eq.f32.partialorder %v509_v16, 8.507059e+37 }
 0x16a   :  { %v1616_v32 = vpop.eup %1615 }
 0x16b   :  { %v484_v6 = vadd.f32 1.0, %v1616_v32 }
 0x16c   :  { %v1618_v7 = vpop.eup %1617 }
 0x16d   :  { %v1620_v21 = vpop.eup %1619  ;;  %v486_v23 = vmul.f32 %v1618_v7, %v482_v36  ;;  %1621 = vrcp.f32 %v484_v6  ;;  %vm491_vm12 = vweird.f32 %v1618_v7  ;;  %v526_v52 = vand.u32 2147483648, %v484_v6 }
 0x16e   :  { %v501_v24 = vmul.f32 %v1620_v21, %v483_v40  ;;  %1623 = vtanh.f32 %v472_v15  ;;  %vm506_vm13 = vweird.f32 %v1620_v21  ;;  %vm492_vm0 = vmor %vm490_vm14, %vm491_vm12  ;;  %vm520_vm5 = vweird.f32 %v484_v6 }
 0x16f   :  { %v487_v43 = vsub.f32 1.0, %v486_v23  ;;  %vm507_vm1 = vmor %vm505_vm15, %vm506_vm13  ;;  %v527_v56 = vor.u32 1.1754944e-38, %v526_v52 }
 0x170   :  { %v502_v38 = vsub.f32 1.0, %v501_v24 }
 0x171   :  { %v488_v27 = vmul.f32 %v1618_v7, %v487_v43 }
 0x172   :  { %v503_v33 = vmul.f32 %v1620_v21, %v502_v38 }
 0x173   :  { %v1622_v11 = vpop.eup %1621  ;;  %v489_v41 = vadd.f32 %v1618_v7, %v488_v27 }
 0x174   :  { %v516_v25 = vmul.f32 %v1622_v11, %v484_v6  ;;  %v504_v32 = vadd.f32 %v1620_v21, %v503_v33  ;;  %v1624_v15 = vpop.eup %1623  ;;  %vm521_vm4 = vweird.f32 %v1622_v11 }
 0x175   :  { %v493_v5 = vsel %vm492_vm0, %v1618_v7, %v489_v41  ;;  %v524_v7 = vand.u32 2147483647, %v484_v6  ;;  %vm522_vm6 = vmor %vm520_vm5, %vm521_vm4 }
 0x176   :  { %v517_v23 = vsub.f32 1.0, %v516_v25  ;;  %v498_v24 = vsel %vm495_vm2, %v497_v42, %v493_v5  ;;  %v508_v43 = vsel %vm507_vm1, %v1620_v21, %v504_v32 }
 0x177   :  { %v513_v38 = vsel %vm510_vm3, %v512_v2, %v508_v43  ;;  %v532_v58 = vmul.f32 %v1624_v15, %v498_v24  ;;  %vm525_vm7 = vcmp.eq.f32.partialorder %v524_v7, 8.507059e+37 }
 0x178   :  { %v531_v62 = vmul.f32 %v513_v38, %v2029_v55  ;;  %v518_v27 = vmul.f32 %v1622_v11, %v517_v23  ;;  %v541_v55 = vpop.permute.xlu1 %540 }
 0x179   :  { %v545_v5 = vmul.f32 %v541_v55, %v2016_v3 }
 0x17a   :  { %v2082_v36 = vadd.f32 %v532_v58, %v531_v62  ;;  %v519_v40 = vadd.f32 %v1622_v11, %v518_v27  ;;  %v543_v62 = vmul.f32 %v541_v55, %v2002_v53  ;;  %v544_v58 = vmul.f32 %v541_v55, %v2004_v54 }
 0x17b   :  { %v549_v24 = vadd.f32 %v545_v5, %v2020_v19 }
 0x17c   :  { %1625 = vtanh.f32 %v2082_v36  ;;  %v523_v0 = vsel %vm522_vm6, %v1622_v11, %v519_v40  ;;  %v547_v6 = vadd.f32 %v543_v62, %v2010_v61  ;;  %v548_v11 = vadd.f32 %v544_v58, %v2013_v63 }
 0x17d   :  { %v528_v33 = vsel %vm525_vm7, %v527_v56, %v523_v0 }
 0x182   :  { %v1626_v21 = vpop.eup %1625 }
 0x183   :  { %v535_v16 = vmul.f32 %v1626_v21, %v528_v33 }
 0x185   :  { %v551_v41 = vpack.c.bf16 %v535_v16, %v535_v16  ;;  %v2309_v16 = vld [vmem:[#allocation8_spill] sm:$0xff] }
 0x187   :  { %560 = vmatmul.bf16.vlgmr.msra.gmra.mxu0 %v551_v41  ;;  %573 = vmatmul.bf16.vlgmr.msra.gmra.mxu1 %v551_v41 }
 0x188   :  { %586 = vmatmul.bf16.vlgmr.msra.gmra.mxu2 %v551_v41  ;;  %599 = vmatmul.bf16.vlgmr.msra.gmra.mxu3 %v551_v41  ;;  %v546_v41 = vmul.f32 %v541_v55, %v2309_v16 }
 0x189   :  { %822 = vmatpush.bf16.msra.mxu0 %v1826_v4  ;;  %835 = vmatpush.bf16.msra.mxu1 %v1828_v8 }
 0x18a   :  { %848 = vmatpush.bf16.msra.mxu2 %v1830_v9  ;;  %861 = vmatpush.bf16.msra.mxu3 %v1833_v13 }
 0x18d   :  { %823 = vmatpush.bf16.msra.mxu0 %v1837_v17  ;;  %836 = vmatpush.bf16.msra.mxu1 %v1839_v18 }
 0x18e   :  { %849 = vmatpush.bf16.msra.mxu2 %v1842_v22  ;;  %862 = vmatpush.bf16.msra.mxu3 %v1844_v26 }
 0x191   :  { %824 = vmatpush.bf16.msra.mxu0 %v1847_v30  ;;  %837 = vmatpush.bf16.msra.mxu1 %v1851_v34 }
 0x192   :  { %850 = vmatpush.bf16.msra.mxu2 %v1853_v35  ;;  %863 = vmatpush.bf16.msra.mxu3 %v1856_v39 }
 0x195   :  { %825 = vmatpush.bf16.msra.mxu0 %v1859_v45  ;;  %838 = vmatpush.bf16.msra.mxu1 %v1863_v46 }
 0x196   :  { %851 = vmatpush.bf16.msra.mxu2 %v1865_v47  ;;  %864 = vmatpush.bf16.msra.mxu3 %v1868_v51 }
 0x199   :  { %826 = vmatpush.bf16.msra.mxu0 %v1871_v57  ;;  %839 = vmatpush.bf16.msra.mxu1 %v1875_v59 }
 0x19a   :  { %852 = vmatpush.bf16.msra.mxu2 %v1877_v60  ;;  %865 = vmatpush.bf16.msra.mxu3 %v1883_v1 }
 0x19d   :  { %827 = vmatpush.bf16.msra.mxu0 %v1886_v10  ;;  %840 = vmatpush.bf16.msra.mxu1 %v1890_v12 }
 0x19e   :  { %853 = vmatpush.bf16.msra.mxu2 %v1892_v14  ;;  %866 = vmatpush.bf16.msra.mxu3 %v1895_v20 }
 0x1a1   :  { %828 = vmatpush.bf16.msra.mxu0 %v1901_v28  ;;  %841 = vmatpush.bf16.msra.mxu1 %v1905_v29 }
 0x1a2   :  { %854 = vmatpush.bf16.msra.mxu2 %v1907_v31  ;;  %867 = vmatpush.bf16.msra.mxu3 %v1910_v37 }
 0x1a5   :  { %829 = vmatpush.bf16.msra.mxu0 %v1913_v44  ;;  %842 = vmatpush.bf16.msra.mxu1 %v1917_v48 }
 0x1a6   :  { %855 = vmatpush.bf16.msra.mxu2 %v1919_v49  ;;  %868 = vmatpush.bf16.msra.mxu3 %v1922_v50 }
 0x204   :  { %v561_v25 = vpop.f32.mrf.mxu0  ;;  %v574_v42 = vpop.f32.mrf.mxu1 }
 0x205   :  { %v604_v32 = vadd.f32 %v561_v25, %v547_v6  ;;  %v605_v2 = vadd.f32 %v574_v42, %v548_v11  ;;  %v2310_v11 = vld [vmem:[#allocation9_spill] sm:$0xff] }
 0x206   :  { %v550_v25 = vadd.f32 %v546_v41, %v2310_v11 }
 0x207   :  { %v1529_v15 = vmul.f32 -1.442695, %v604_v32  ;;  %v1530_v23 = vmul.f32 -1.442695, %v605_v2 }
 0x209   :  { %1627 = vpow2.f32 %v1529_v15 }
 0x20a   :  { %1629 = vpow2.f32 %v1530_v23 }
 0x20b   :  { %v587_v43 = vpop.f32.mrf.mxu2  ;;  %v600_v38 = vpop.f32.mrf.mxu3 }
 0x20c   :  { %v606_v27 = vadd.f32 %v587_v43, %v549_v24  ;;  %v563_v40 = vpop.f32.mrf.mxu0  ;;  %v576_v52 = vpop.f32.mrf.mxu1  ;;  %v607_v2 = vadd.f32 %v600_v38, %v550_v25 }
 0x20e   :  { %v1531_v7 = vmul.f32 -1.442695, %v606_v27 }
 0x20f   :  { %v1628_v0 = vpop.eup %1627 }
 0x210   :  { %v1630_v56 = vpop.eup %1629  ;;  %v617_v21 = vadd.f32 1.0, %v1628_v0  ;;  %1631 = vpow2.f32 %v1531_v7 }
 0x211   :  { %v618_v33 = vadd.f32 1.0, %v1630_v56 }
 0x212   :  { %1633 = vrcp.f32 %v617_v21  ;;  %v631_v27 = vand.u32 2147483648, %v617_v21  ;;  %v629_v55 = vand.u32 2147483647, %v617_v21  ;;  %vm625_vm10 = vweird.f32 %v617_v21 }
 0x213   :  { %1635 = vrcp.f32 %v618_v33  ;;  %v589_v62 = vpop.f32.mrf.mxu2  ;;  %v602_v58 = vpop.f32.mrf.mxu3  ;;  %v646_v40 = vand.u32 2147483648, %v618_v33  ;;  %v644_v0 = vand.u32 2147483647, %v618_v33  ;;  %vm640_vm11 = vweird.f32 %v618_v33 }
 0x214   :  { %v632_v62 = vor.u32 1.1754944e-38, %v631_v27  ;;  %vm630_vm14 = vcmp.eq.f32.partialorder %v629_v55, 8.507059e+37 }
 0x215   :  { %vm645_vm15 = vcmp.eq.f32.partialorder %v644_v0, 8.507059e+37 }
 0x216   :  { %v1632_v6 = vpop.eup %1631 }
 0x217   :  { %v619_v42 = vadd.f32 1.0, %v1632_v6  ;;  %v647_v6 = vor.u32 1.1754944e-38, %v646_v40 }
 0x218   :  { %v1634_v32 = vpop.eup %1633 }
 0x219   :  { %v1636_v5 = vpop.eup %1635  ;;  %v621_v15 = vmul.f32 %v1634_v32, %v617_v21  ;;  %1637 = vrcp.f32 %v619_v42  ;;  %vm626_vm8 = vweird.f32 %v1634_v32  ;;  %v661_v27 = vand.u32 2147483648, %v619_v42 }
 0x21a   :  { %v636_v23 = vmul.f32 %v1636_v5, %v618_v33  ;;  %1639 = vtanh.f32 %v607_v2  ;;  %vm641_vm9 = vweird.f32 %v1636_v5  ;;  %vm627_vm12 = vmor %vm625_vm10, %vm626_vm8  ;;  %vm655_vm1 = vweird.f32 %v619_v42 }
 0x21b   :  { %v622_v24 = vsub.f32 1.0, %v621_v15  ;;  %vm642_vm13 = vmor %vm640_vm11, %vm641_vm9  ;;  %v662_v55 = vor.u32 1.1754944e-38, %v661_v27 }
 0x21c   :  { %v637_v43 = vsub.f32 1.0, %v636_v23 }
 0x21d   :  { %v623_v52 = vmul.f32 %v1634_v32, %v622_v24 }
 0x21e   :  { %v638_v7 = vmul.f32 %v1636_v5, %v637_v43 }
 0x21f   :  { %v1638_v56 = vpop.eup %1637  ;;  %v624_v41 = vadd.f32 %v1634_v32, %v623_v52 }
 0x220   :  { %v651_v38 = vmul.f32 %v1638_v56, %v619_v42  ;;  %v639_v58 = vadd.f32 %v1636_v5, %v638_v7  ;;  %v1640_v2 = vpop.eup %1639  ;;  %vm656_vm0 = vweird.f32 %v1638_v56 }
 0x221   :  { %v628_v25 = vsel %vm627_vm12, %v1634_v32, %v624_v41  ;;  %v659_v32 = vand.u32 2147483647, %v619_v42  ;;  %vm657_vm2 = vmor %vm655_vm1, %vm656_vm0 }
 0x222   :  { %v652_v15 = vsub.f32 1.0, %v651_v38  ;;  %v633_v23 = vsel %vm630_vm14, %v632_v62, %v628_v25  ;;  %v643_v24 = vsel %vm642_vm13, %v1636_v5, %v639_v58 }
 0x223   :  { %v648_v43 = vsel %vm645_vm15, %v647_v6, %v643_v24  ;;  %v667_v11 = vmul.f32 %v1640_v2, %v633_v23  ;;  %vm660_vm3 = vcmp.eq.f32.partialorder %v659_v32, 8.507059e+37 }
 0x224   :  { %v666_v16 = vmul.f32 %v648_v43, %v2082_v36  ;;  %v653_v52 = vmul.f32 %v1638_v56, %v652_v15  ;;  %v676_v36 = vpop.permute.xlu1 %675 }
 0x225   :  { %v680_v25 = vmul.f32 %v676_v36, %v2016_v3 }
 0x226   :  { %v2126_v21 = vadd.f32 %v667_v11, %v666_v16  ;;  %v654_v33 = vadd.f32 %v1638_v56, %v653_v52  ;;  %v678_v16 = vmul.f32 %v676_v36, %v2002_v53  ;;  %v679_v11 = vmul.f32 %v676_v36, %v2004_v54 }
 0x227   :  { %v684_v23 = vadd.f32 %v680_v25, %v2020_v19 }
 0x228   :  { %1641 = vtanh.f32 %v2126_v21  ;;  %v658_v40 = vsel %vm657_vm2, %v1638_v56, %v654_v33  ;;  %v682_v42 = vadd.f32 %v678_v16, %v2010_v61  ;;  %v683_v56 = vadd.f32 %v679_v11, %v2013_v63 }
 0x229   :  { %v663_v7 = vsel %vm660_vm3, %v662_v55, %v658_v40 }
 0x22e   :  { %v1642_v5 = vpop.eup %1641 }
 0x22f   :  { %v670_v0 = vmul.f32 %v1642_v5, %v663_v7 }
 0x231   :  { %v686_v41 = vpack.c.bf16 %v670_v0, %v670_v0  ;;  %v2311_v0 = vld [vmem:[#allocation8_spill] sm:$0xff] }
 0x233   :  { %695 = vmatmul.bf16.vlgmr.msrb.gmra.mxu0 %v686_v41  ;;  %708 = vmatmul.bf16.vlgmr.msrb.gmra.mxu1 %v686_v41 }
 0x234   :  { %721 = vmatmul.bf16.vlgmr.msrb.gmra.mxu2 %v686_v41  ;;  %734 = vmatmul.bf16.vlgmr.msrb.gmra.mxu3 %v686_v41  ;;  %v681_v41 = vmul.f32 %v676_v36, %v2311_v0  ;;  %v1540_v36 = vld [vmem:[%s2294_s0 + $0x28] sm:$0xff] }
 0x235   :  { %957 = vmatpush.bf16.msrb.mxu0 %v1826_v4  ;;  %970 = vmatpush.bf16.msrb.mxu1 %v1828_v8 }
 0x236   :  { %983 = vmatpush.bf16.msrb.mxu2 %v1830_v9  ;;  %996 = vmatpush.bf16.msrb.mxu3 %v1833_v13 }
 0x239   :  { %958 = vmatpush.bf16.msrb.mxu0 %v1837_v17  ;;  %971 = vmatpush.bf16.msrb.mxu1 %v1839_v18 }
 0x23a   :  { %984 = vmatpush.bf16.msrb.mxu2 %v1842_v22  ;;  %997 = vmatpush.bf16.msrb.mxu3 %v1844_v26 }
 0x23d   :  { %959 = vmatpush.bf16.msrb.mxu0 %v1847_v30  ;;  %972 = vmatpush.bf16.msrb.mxu1 %v1851_v34 }
 0x23e   :  { %985 = vmatpush.bf16.msrb.mxu2 %v1853_v35  ;;  %998 = vmatpush.bf16.msrb.mxu3 %v1856_v39 }
 0x241   :  { %960 = vmatpush.bf16.msrb.mxu0 %v1859_v45  ;;  %973 = vmatpush.bf16.msrb.mxu1 %v1863_v46 }
 0x242   :  { %986 = vmatpush.bf16.msrb.mxu2 %v1865_v47  ;;  %999 = vmatpush.bf16.msrb.mxu3 %v1868_v51 }
 0x245   :  { %961 = vmatpush.bf16.msrb.mxu0 %v1871_v57  ;;  %974 = vmatpush.bf16.msrb.mxu1 %v1875_v59 }
 0x246   :  { %987 = vmatpush.bf16.msrb.mxu2 %v1877_v60  ;;  %1000 = vmatpush.bf16.msrb.mxu3 %v1883_v1 }
 0x249   :  { %962 = vmatpush.bf16.msrb.mxu0 %v1886_v10  ;;  %975 = vmatpush.bf16.msrb.mxu1 %v1890_v12 }
 0x24a   :  { %988 = vmatpush.bf16.msrb.mxu2 %v1892_v14  ;;  %1001 = vmatpush.bf16.msrb.mxu3 %v1895_v20 }
 0x24d   :  { %963 = vmatpush.bf16.msrb.mxu0 %v1901_v28  ;;  %976 = vmatpush.bf16.msrb.mxu1 %v1905_v29 }
 0x24e   :  { %989 = vmatpush.bf16.msrb.mxu2 %v1907_v31  ;;  %1002 = vmatpush.bf16.msrb.mxu3 %v1910_v37 }
 0x251   :  { %964 = vmatpush.bf16.msrb.mxu0 %v1913_v44  ;;  %977 = vmatpush.bf16.msrb.mxu1 %v1917_v48 }
 0x252   :  { %990 = vmatpush.bf16.msrb.mxu2 %v1919_v49  ;;  %1003 = vmatpush.bf16.msrb.mxu3 %v1922_v50 }
 0x2b0   :  { %v696_v38 = vpop.f32.mrf.mxu0  ;;  %v709_v62 = vpop.f32.mrf.mxu1 }
 0x2b1   :  { %v739_v58 = vadd.f32 %v696_v38, %v682_v42  ;;  %v740_v6 = vadd.f32 %v709_v62, %v683_v56  ;;  %v1536_v42 = vld [vmem:[%s2294_s0 + $0x20] sm:$0xff]  ;;  %v2312_v38 = vld [vmem:[#allocation9_spill] sm:$0xff] }
 0x2b2   :  { %810 = vperm.xlu2 %1593, %v1536_v42   ;;  %v685_v62 = vadd.f32 %v681_v41, %v2312_v38 }
 0x2b3   :  { %v1533_v2 = vmul.f32 -1.442695, %v739_v58  ;;  %v1534_v15 = vmul.f32 -1.442695, %v740_v6 }
 0x2b5   :  { %1643 = vpow2.f32 %v1533_v2 }
 0x2b6   :  { %1645 = vpow2.f32 %v1534_v15 }
 0x2b7   :  { %v722_v24 = vpop.f32.mrf.mxu2  ;;  %v735_v43 = vpop.f32.mrf.mxu3 }
 0x2b8   :  { %v741_v52 = vadd.f32 %v722_v24, %v684_v23  ;;  %v698_v33 = vpop.f32.mrf.mxu0  ;;  %v711_v27 = vpop.f32.mrf.mxu1  ;;  %v742_v25 = vadd.f32 %v735_v43, %v685_v62 }
 0x2ba   :  { %v1535_v32 = vmul.f32 -1.442695, %v741_v52  ;;  %945 = vperm.xlu2 %1593, %v1540_v36  }
 0x2bb   :  { %v1644_v40 = vpop.eup %1643 }
 0x2bc   :  { %v1646_v55 = vpop.eup %1645  ;;  %v752_v5 = vadd.f32 1.0, %v1644_v40  ;;  %1647 = vpow2.f32 %v1535_v32 }
 0x2bd   :  { %v753_v7 = vadd.f32 1.0, %v1646_v55 }
 0x2be   :  { %1649 = vrcp.f32 %v752_v5  ;;  %v766_v33 = vand.u32 2147483648, %v752_v5  ;;  %v764_v40 = vand.u32 2147483647, %v752_v5  ;;  %vm760_vm6 = vweird.f32 %v752_v5 }
 0x2bf   :  { %1651 = vrcp.f32 %v753_v7  ;;  %v724_v16 = vpop.f32.mrf.mxu2  ;;  %v737_v11 = vpop.f32.mrf.mxu3  ;;  %v781_v27 = vand.u32 2147483648, %v753_v7  ;;  %v779_v43 = vand.u32 2147483647, %v753_v7  ;;  %vm775_vm7 = vweird.f32 %v753_v7 }
 0x2c0   :  { %v767_v42 = vor.u32 1.1754944e-38, %v766_v33  ;;  %vm765_vm10 = vcmp.eq.f32.partialorder %v764_v40, 8.507059e+37 }
 0x2c1   :  { %v782_v62 = vor.u32 1.1754944e-38, %v781_v27  ;;  %vm780_vm11 = vcmp.eq.f32.partialorder %v779_v43, 8.507059e+37 }
 0x2c2   :  { %v1648_v56 = vpop.eup %1647 }
 0x2c3   :  { %v754_v58 = vadd.f32 1.0, %v1648_v56 }
 0x2c4   :  { %v1650_v6 = vpop.eup %1649 }
 0x2c5   :  { %v1652_v2 = vpop.eup %1651  ;;  %v756_v15 = vmul.f32 %v1650_v6, %v752_v5  ;;  %1653 = vrcp.f32 %v754_v58  ;;  %vm761_vm4 = vweird.f32 %v1650_v6  ;;  %v796_v33 = vand.u32 2147483648, %v754_v58 }
 0x2c6   :  { %v771_v23 = vmul.f32 %v1652_v2, %v753_v7  ;;  %1655 = vtanh.f32 %v742_v25  ;;  %vm776_vm5 = vweird.f32 %v1652_v2  ;;  %vm762_vm8 = vmor %vm760_vm6, %vm761_vm4  ;;  %vm790_vm13 = vweird.f32 %v754_v58 }
 0x2c7   :  { %v757_v24 = vsub.f32 1.0, %v756_v15  ;;  %vm777_vm9 = vmor %vm775_vm7, %vm776_vm5  ;;  %v797_v40 = vor.u32 1.1754944e-38, %v796_v33 }
 0x2c8   :  { %v772_v52 = vsub.f32 1.0, %v771_v23 }
 0x2c9   :  { %v758_v32 = vmul.f32 %v1650_v6, %v757_v24 }
 0x2ca   :  { %v773_v55 = vmul.f32 %v1652_v2, %v772_v52 }
 0x2cb   :  { %v1654_v41 = vpop.eup %1653  ;;  %v759_v16 = vadd.f32 %v1650_v6, %v758_v32 }
 0x2cc   :  { %v786_v11 = vmul.f32 %v1654_v41, %v754_v58  ;;  %v774_v56 = vadd.f32 %v1652_v2, %v773_v55  ;;  %v1656_v25 = vpop.eup %1655  ;;  %vm791_vm12 = vweird.f32 %v1654_v41 }
 0x2cd   :  { %v763_v15 = vsel %vm762_vm8, %v1650_v6, %v759_v16  ;;  %v794_v6 = vand.u32 2147483647, %v754_v58  ;;  %vm792_vm14 = vmor %vm790_vm13, %vm791_vm12 }
 0x2ce   :  { %v787_v23 = vsub.f32 1.0, %v786_v11  ;;  %v768_v24 = vsel %vm765_vm10, %v767_v42, %v763_v15  ;;  %v778_v38 = vsel %vm777_vm9, %v1652_v2, %v774_v56 }
 0x2cf   :  { %v783_v36 = vsel %vm780_vm11, %v782_v62, %v778_v38  ;;  %v802_v52 = vmul.f32 %v1656_v25, %v768_v24  ;;  %vm795_vm15 = vcmp.eq.f32.partialorder %v794_v6, 8.507059e+37 }
 0x2d0   :  { %v801_v0 = vmul.f32 %v783_v36, %v2126_v21  ;;  %v788_v32 = vmul.f32 %v1654_v41, %v787_v23 }
 0x2d2   :  { %v2176_v5 = vadd.f32 %v802_v52, %v801_v0  ;;  %v789_v7 = vadd.f32 %v1654_v41, %v788_v32 }
 0x2d4   :  { %1657 = vtanh.f32 %v2176_v5  ;;  %v793_v27 = vsel %vm792_vm14, %v1654_v41, %v789_v7 }
 0x2d5   :  { %v798_v55 = vsel %vm795_vm15, %v797_v40, %v793_v27 }
 0x2da   :  { %v1658_v2 = vpop.eup %1657 }
 0x2db   :  { %v805_v38 = vmul.f32 %v1658_v2, %v798_v55 }
 0x2dd   :  { %v821_v43 = vpack.c.bf16 %v805_v38, %v805_v38  ;;  %v2313_v38 = vld [vmem:[#allocation8_spill] sm:$0xff] }
 0x2df   :  { %830 = vmatmul.bf16.vlgmr.msra.gmra.mxu0 %v821_v43  ;;  %843 = vmatmul.bf16.vlgmr.msra.gmra.mxu1 %v821_v43 }
 0x2e0   :  { %856 = vmatmul.bf16.vlgmr.msra.gmra.mxu2 %v821_v43  ;;  %869 = vmatmul.bf16.vlgmr.msra.gmra.mxu3 %v821_v43 }
 0x2e1   :  { %1092 = vmatpush.bf16.msra.mxu0 %v1826_v4  ;;  %1105 = vmatpush.bf16.msra.mxu1 %v1828_v8 }
 0x2e2   :  { %1118 = vmatpush.bf16.msra.mxu2 %v1830_v9  ;;  %1131 = vmatpush.bf16.msra.mxu3 %v1833_v13 }
 0x2e5   :  { %1093 = vmatpush.bf16.msra.mxu0 %v1837_v17  ;;  %1106 = vmatpush.bf16.msra.mxu1 %v1839_v18 }
 0x2e6   :  { %1119 = vmatpush.bf16.msra.mxu2 %v1842_v22  ;;  %1132 = vmatpush.bf16.msra.mxu3 %v1844_v26 }
 0x2e9   :  { %1094 = vmatpush.bf16.msra.mxu0 %v1847_v30  ;;  %1107 = vmatpush.bf16.msra.mxu1 %v1851_v34 }
 0x2ea   :  { %1120 = vmatpush.bf16.msra.mxu2 %v1853_v35  ;;  %1133 = vmatpush.bf16.msra.mxu3 %v1856_v39 }
 0x2ed   :  { %1095 = vmatpush.bf16.msra.mxu0 %v1859_v45  ;;  %1108 = vmatpush.bf16.msra.mxu1 %v1863_v46 }
 0x2ee   :  { %1121 = vmatpush.bf16.msra.mxu2 %v1865_v47  ;;  %1134 = vmatpush.bf16.msra.mxu3 %v1868_v51 }
 0x2f1   :  { %1096 = vmatpush.bf16.msra.mxu0 %v1871_v57  ;;  %1109 = vmatpush.bf16.msra.mxu1 %v1875_v59 }
 0x2f2   :  { %1122 = vmatpush.bf16.msra.mxu2 %v1877_v60  ;;  %1135 = vmatpush.bf16.msra.mxu3 %v1883_v1 }
 0x2f5   :  { %1097 = vmatpush.bf16.msra.mxu0 %v1886_v10  ;;  %1110 = vmatpush.bf16.msra.mxu1 %v1890_v12 }
 0x2f6   :  { %1123 = vmatpush.bf16.msra.mxu2 %v1892_v14  ;;  %1136 = vmatpush.bf16.msra.mxu3 %v1895_v20 }
 0x2f9   :  { %1098 = vmatpush.bf16.msra.mxu0 %v1901_v28  ;;  %1111 = vmatpush.bf16.msra.mxu1 %v1905_v29 }
 0x2fa   :  { %1124 = vmatpush.bf16.msra.mxu2 %v1907_v31  ;;  %1137 = vmatpush.bf16.msra.mxu3 %v1910_v37 }
 0x2fd   :  { %1099 = vmatpush.bf16.msra.mxu0 %v1913_v44  ;;  %1112 = vmatpush.bf16.msra.mxu1 %v1917_v48 }
 0x2fe   :  { %1125 = vmatpush.bf16.msra.mxu2 %v1919_v49  ;;  %1138 = vmatpush.bf16.msra.mxu3 %v1922_v50 }
 0x30c   :  { %v811_v21 = vpop.permute.xlu2 %810 }
 0x30d   :  { %v813_v0 = vmul.f32 %v811_v21, %v2002_v53  ;;  %v814_v58 = vmul.f32 %v811_v21, %v2004_v54  ;;  %v815_v15 = vmul.f32 %v811_v21, %v2016_v3  ;;  %v816_v43 = vmul.f32 %v811_v21, %v2313_v38 }
 0x30f   :  { %v817_v41 = vadd.f32 %v813_v0, %v2010_v61  ;;  %v818_v16 = vadd.f32 %v814_v58, %v2013_v63  ;;  %v819_v24 = vadd.f32 %v815_v15, %v2020_v19 }
 0x35c   :  { %v831_v11 = vpop.f32.mrf.mxu0  ;;  %v844_v42 = vpop.f32.mrf.mxu1 }
 0x35d   :  { %v874_v56 = vadd.f32 %v831_v11, %v817_v41  ;;  %v875_v62 = vadd.f32 %v844_v42, %v818_v16  ;;  %v2314_v16 = vld [vmem:[#allocation9_spill] sm:$0xff] }
 0x35e   :  { %v820_v11 = vadd.f32 %v816_v43, %v2314_v16 }
 0x35f   :  { %v1537_v25 = vmul.f32 -1.442695, %v874_v56  ;;  %v1538_v23 = vmul.f32 -1.442695, %v875_v62 }
 0x361   :  { %1659 = vpow2.f32 %v1537_v25 }
 0x362   :  { %1661 = vpow2.f32 %v1538_v23 }
 0x363   :  { %v857_v36 = vpop.f32.mrf.mxu2  ;;  %v870_v52 = vpop.f32.mrf.mxu3 }
 0x364   :  { %v876_v32 = vadd.f32 %v857_v36, %v819_v24  ;;  %v833_v7 = vpop.f32.mrf.mxu0  ;;  %v846_v33 = vpop.f32.mrf.mxu1  ;;  %v877_v62 = vadd.f32 %v870_v52, %v820_v11 }
 0x366   :  { %v1539_v6 = vmul.f32 -1.442695, %v876_v32 }
 0x367   :  { %v1660_v27 = vpop.eup %1659 }
 0x368   :  { %v1662_v40 = vpop.eup %1661  ;;  %v887_v2 = vadd.f32 1.0, %v1660_v27  ;;  %1663 = vpow2.f32 %v1539_v6 }
 0x369   :  { %v888_v55 = vadd.f32 1.0, %v1662_v40 }
 0x36a   :  { %1665 = vrcp.f32 %v887_v2  ;;  %v901_v32 = vand.u32 2147483648, %v887_v2  ;;  %v899_v21 = vand.u32 2147483647, %v887_v2  ;;  %vm895_vm2 = vweird.f32 %v887_v2 }
 0x36b   :  { %1667 = vrcp.f32 %v888_v55  ;;  %v859_v0 = vpop.f32.mrf.mxu2  ;;  %v872_v58 = vpop.f32.mrf.mxu3  ;;  %v916_v7 = vand.u32 2147483648, %v888_v55  ;;  %v914_v27 = vand.u32 2147483647, %v888_v55  ;;  %vm910_vm3 = vweird.f32 %v888_v55 }
 0x36c   :  { %v902_v0 = vor.u32 1.1754944e-38, %v901_v32  ;;  %vm900_vm6 = vcmp.eq.f32.partialorder %v899_v21, 8.507059e+37 }
 0x36d   :  { %vm915_vm7 = vcmp.eq.f32.partialorder %v914_v27, 8.507059e+37 }
 0x36e   :  { %v1664_v41 = vpop.eup %1663 }
 0x36f   :  { %v889_v42 = vadd.f32 1.0, %v1664_v41  ;;  %v917_v41 = vor.u32 1.1754944e-38, %v916_v7 }
 0x370   :  { %v1666_v56 = vpop.eup %1665 }
 0x371   :  { %v1668_v15 = vpop.eup %1667  ;;  %v891_v25 = vmul.f32 %v1666_v56, %v887_v2  ;;  %1669 = vrcp.f32 %v889_v42  ;;  %vm896_vm0 = vweird.f32 %v1666_v56  ;;  %v931_v32 = vand.u32 2147483648, %v889_v42 }
 0x372   :  { %v906_v23 = vmul.f32 %v1668_v15, %v888_v55  ;;  %1671 = vtanh.f32 %v877_v62  ;;  %vm911_vm1 = vweird.f32 %v1668_v15  ;;  %vm897_vm4 = vmor %vm895_vm2, %vm896_vm0  ;;  %vm925_vm9 = vweird.f32 %v889_v42 }
 0x373   :  { %v892_v24 = vsub.f32 1.0, %v891_v25  ;;  %vm912_vm5 = vmor %vm910_vm3, %vm911_vm1  ;;  %v932_v21 = vor.u32 1.1754944e-38, %v931_v32 }
 0x374   :  { %v907_v36 = vsub.f32 1.0, %v906_v23 }
 0x375   :  { %v893_v33 = vmul.f32 %v1666_v56, %v892_v24 }
 0x376   :  { %v908_v6 = vmul.f32 %v1668_v15, %v907_v36 }
 0x377   :  { %v1670_v40 = vpop.eup %1669  ;;  %v894_v43 = vadd.f32 %v1666_v56, %v893_v33 }
 0x378   :  { %v921_v52 = vmul.f32 %v1670_v40, %v889_v42  ;;  %v909_v58 = vadd.f32 %v1668_v15, %v908_v6  ;;  %v1672_v62 = vpop.eup %1671  ;;  %vm926_vm8 = vweird.f32 %v1670_v40 }
 0x379   :  { %v898_v11 = vsel %vm897_vm4, %v1666_v56, %v894_v43  ;;  %v929_v56 = vand.u32 2147483647, %v889_v42  ;;  %vm927_vm10 = vmor %vm925_vm9, %vm926_vm8 }
 0x37a   :  { %v922_v25 = vsub.f32 1.0, %v921_v52  ;;  %v903_v23 = vsel %vm900_vm6, %v902_v0, %v898_v11  ;;  %v913_v24 = vsel %vm912_vm5, %v1668_v15, %v909_v58 }
 0x37b   :  { %v918_v36 = vsel %vm915_vm7, %v917_v41, %v913_v24  ;;  %v937_v16 = vmul.f32 %v1672_v62, %v903_v23  ;;  %vm930_vm11 = vcmp.eq.f32.partialorder %v929_v56, 8.507059e+37 }
 0x37c   :  { %v936_v38 = vmul.f32 %v918_v36, %v2176_v5  ;;  %v923_v33 = vmul.f32 %v1670_v40, %v922_v25 }
 0x37e   :  { %v2220_v2 = vadd.f32 %v937_v16, %v936_v38  ;;  %v924_v55 = vadd.f32 %v1670_v40, %v923_v33 }
 0x380   :  { %1673 = vtanh.f32 %v2220_v2  ;;  %v928_v7 = vsel %vm927_vm10, %v1670_v40, %v924_v55 }
 0x381   :  { %v933_v6 = vsel %vm930_vm11, %v932_v21, %v928_v7 }
 0x386   :  { %v1674_v15 = vpop.eup %1673 }
 0x387   :  { %v940_v27 = vmul.f32 %v1674_v15, %v933_v6 }
 0x389   :  { %v956_v43 = vpack.c.bf16 %v940_v27, %v940_v27 }
 0x38b   :  { %965 = vmatmul.bf16.vlgmr.msrb.gmra.mxu0 %v956_v43  ;;  %978 = vmatmul.bf16.vlgmr.msrb.gmra.mxu1 %v956_v43 }
 0x38c   :  { %991 = vmatmul.bf16.vlgmr.msrb.gmra.mxu2 %v956_v43  ;;  %1004 = vmatmul.bf16.vlgmr.msrb.gmra.mxu3 %v956_v43 }
 0x38d   :  { %1227 = vmatpush.bf16.msrb.mxu0 %v1826_v4  ;;  %1240 = vmatpush.bf16.msrb.mxu1 %v1828_v8  ;;  %v946_v4 = vpop.permute.xlu2 %945 }
 0x38e   :  { %1253 = vmatpush.bf16.msrb.mxu2 %v1830_v9  ;;  %1266 = vmatpush.bf16.msrb.mxu3 %v1833_v13  ;;  %v948_v8 = vmul.f32 %v946_v4, %v2002_v53  ;;  %v949_v9 = vmul.f32 %v946_v4, %v2004_v54 }
 0x390   :  { %v952_v13 = vadd.f32 %v948_v8, %v2010_v61 }
 0x391   :  { %1228 = vmatpush.bf16.msrb.mxu0 %v1837_v17  ;;  %1241 = vmatpush.bf16.msrb.mxu1 %v1839_v18  ;;  %v953_v17 = vadd.f32 %v949_v9, %v2013_v63 }
 0x392   :  { %1254 = vmatpush.bf16.msrb.mxu2 %v1842_v22  ;;  %1267 = vmatpush.bf16.msrb.mxu3 %v1844_v26 }
 0x395   :  { %1229 = vmatpush.bf16.msrb.mxu0 %v1847_v30  ;;  %1242 = vmatpush.bf16.msrb.mxu1 %v1851_v34  ;;  %v950_v34 = vmul.f32 %v946_v4, %v2016_v3 }
 0x396   :  { %1255 = vmatpush.bf16.msrb.mxu2 %v1853_v35  ;;  %1268 = vmatpush.bf16.msrb.mxu3 %v1856_v39 }
 0x399   :  { %1230 = vmatpush.bf16.msrb.mxu0 %v1859_v45  ;;  %1243 = vmatpush.bf16.msrb.mxu1 %v1863_v46  ;;  %v954_v45 = vadd.f32 %v950_v34, %v2020_v19 }
 0x39a   :  { %1256 = vmatpush.bf16.msrb.mxu2 %v1865_v47  ;;  %1269 = vmatpush.bf16.msrb.mxu3 %v1868_v51 }
 0x39d   :  { %1231 = vmatpush.bf16.msrb.mxu0 %v1871_v57  ;;  %1244 = vmatpush.bf16.msrb.mxu1 %v1875_v59 }
 0x39e   :  { %1257 = vmatpush.bf16.msrb.mxu2 %v1877_v60  ;;  %1270 = vmatpush.bf16.msrb.mxu3 %v1883_v1 }
 0x3a1   :  { %1232 = vmatpush.bf16.msrb.mxu0 %v1886_v10  ;;  %1245 = vmatpush.bf16.msrb.mxu1 %v1890_v12 }
 0x3a2   :  { %1258 = vmatpush.bf16.msrb.mxu2 %v1892_v14  ;;  %1271 = vmatpush.bf16.msrb.mxu3 %v1895_v20  ;;  %v2315_v20 = vld [vmem:[#allocation8_spill] sm:$0xff] }
 0x3a5   :  { %1233 = vmatpush.bf16.msrb.mxu0 %v1901_v28  ;;  %1246 = vmatpush.bf16.msrb.mxu1 %v1905_v29  ;;  %v951_v28 = vmul.f32 %v946_v4, %v2315_v20 }
 0x3a6   :  { %1259 = vmatpush.bf16.msrb.mxu2 %v1907_v31  ;;  %1272 = vmatpush.bf16.msrb.mxu3 %v1910_v37 }
 0x3a9   :  { %1234 = vmatpush.bf16.msrb.mxu0 %v1913_v44  ;;  %1247 = vmatpush.bf16.msrb.mxu1 %v1917_v48  ;;  %v2316_v44 = vld [vmem:[#allocation9_spill] sm:$0xff] }
 0x3aa   :  { %1260 = vmatpush.bf16.msrb.mxu2 %v1919_v49  ;;  %1273 = vmatpush.bf16.msrb.mxu3 %v1922_v50  ;;  %v955_v48 = vadd.f32 %v951_v28, %v2316_v44 }
 0x408   :  { %v966_v18 = vpop.f32.mrf.mxu0  ;;  %v979_v22 = vpop.f32.mrf.mxu1 }
 0x409   :  { %v1009_v26 = vadd.f32 %v966_v18, %v952_v13  ;;  %v1010_v30 = vadd.f32 %v979_v22, %v953_v17 }
 0x40b   :  { %v1541_v35 = vmul.f32 -1.442695, %v1009_v26  ;;  %v1542_v39 = vmul.f32 -1.442695, %v1010_v30 }
 0x40d   :  { %1675 = vpow2.f32 %v1541_v35 }
 0x40e   :  { %1677 = vpow2.f32 %v1542_v39 }
 0x40f   :  { %v992_v46 = vpop.f32.mrf.mxu2  ;;  %v1005_v47 = vpop.f32.mrf.mxu3 }
 0x410   :  { %v1011_v51 = vadd.f32 %v992_v46, %v954_v45  ;;  %v968_v57 = vpop.f32.mrf.mxu0  ;;  %v981_v59 = vpop.f32.mrf.mxu1  ;;  %v1012_v5 = vadd.f32 %v1005_v47, %v955_v48 }
 0x412   :  { %v1543_v60 = vmul.f32 -1.442695, %v1011_v51 }
 0x413   :  { %v1676_v1 = vpop.eup %1675 }
 0x414   :  { %v1678_v10 = vpop.eup %1677  ;;  %v1022_v12 = vadd.f32 1.0, %v1676_v1  ;;  %1679 = vpow2.f32 %v1543_v60 }
 0x415   :  { %v1023_v14 = vadd.f32 1.0, %v1678_v10 }
 0x416   :  { %1681 = vrcp.f32 %v1022_v12  ;;  %v1036_v0 = vand.u32 2147483648, %v1022_v12  ;;  %v1034_v11 = vand.u32 2147483647, %v1022_v12  ;;  %vm1030_vm14 = vweird.f32 %v1022_v12 }
 0x417   :  { %1683 = vrcp.f32 %v1023_v14  ;;  %v994_v29 = vpop.f32.mrf.mxu2  ;;  %v1007_v31 = vpop.f32.mrf.mxu3  ;;  %v1051_v58 = vand.u32 2147483648, %v1023_v14  ;;  %v1049_v25 = vand.u32 2147483647, %v1023_v14  ;;  %vm1045_vm15 = vweird.f32 %v1023_v14 }
 0x418   :  { %v1037_v33 = vor.u32 1.1754944e-38, %v1036_v0  ;;  %vm1035_vm2 = vcmp.eq.f32.partialorder %v1034_v11, 8.507059e+37 }
 0x419   :  { %v1052_v32 = vor.u32 1.1754944e-38, %v1051_v58  ;;  %vm1050_vm3 = vcmp.eq.f32.partialorder %v1049_v25, 8.507059e+37 }
 0x41a   :  { %v1680_v37 = vpop.eup %1679 }
 0x41b   :  { %v1024_v49 = vadd.f32 1.0, %v1680_v37 }
 0x41c   :  { %v1682_v50 = vpop.eup %1681 }
 0x41d   :  { %v1684_v38 = vpop.eup %1683  ;;  %v1026_v16 = vmul.f32 %v1682_v50, %v1022_v12  ;;  %1685 = vrcp.f32 %v1024_v49  ;;  %vm1031_vm12 = vweird.f32 %v1682_v50  ;;  %v1066_v17 = vand.u32 2147483648, %v1024_v49 }
 0x41e   :  { %v1041_v42 = vmul.f32 %v1684_v38, %v1023_v14  ;;  %1687 = vtanh.f32 %v1012_v5  ;;  %vm1046_vm13 = vweird.f32 %v1684_v38  ;;  %vm1032_vm0 = vmor %vm1030_vm14, %vm1031_vm12  ;;  %vm1060_vm5 = vweird.f32 %v1024_v49 }
 0x41f   :  { %v1027_v40 = vsub.f32 1.0, %v1026_v16  ;;  %vm1047_vm1 = vmor %vm1045_vm15, %vm1046_vm13  ;;  %v1064_v18 = vand.u32 2147483647, %v1024_v49  ;;  %v1067_v26 = vor.u32 1.1754944e-38, %v1066_v17 }
 0x420   :  { %v1042_v52 = vsub.f32 1.0, %v1041_v42 }
 0x421   :  { %v1028_v41 = vmul.f32 %v1682_v50, %v1027_v40  ;;  %vm1065_vm7 = vcmp.eq.f32.partialorder %v1064_v18, 8.507059e+37 }
 0x422   :  { %v1043_v62 = vmul.f32 %v1684_v38, %v1042_v52 }
 0x423   :  { %v1686_v23 = vpop.eup %1685  ;;  %v1029_v24 = vadd.f32 %v1682_v50, %v1028_v41 }
 0x424   :  { %v1056_v36 = vmul.f32 %v1686_v23, %v1024_v49  ;;  %v1044_v55 = vadd.f32 %v1684_v38, %v1043_v62  ;;  %v1688_v7 = vpop.eup %1687  ;;  %vm1061_vm4 = vweird.f32 %v1686_v23 }
 0x425   :  { %v1033_v56 = vsel %vm1032_vm0, %v1682_v50, %v1029_v24  ;;  %vm1062_vm6 = vmor %vm1060_vm5, %vm1061_vm4 }
 0x426   :  { %v1057_v21 = vsub.f32 1.0, %v1056_v36  ;;  %v1038_v15 = vsel %vm1035_vm2, %v1037_v33, %v1033_v56  ;;  %v1048_v6 = vsel %vm1047_vm1, %v1684_v38, %v1044_v55 }
 0x427   :  { %v1053_v27 = vsel %vm1050_vm3, %v1052_v32, %v1048_v6  ;;  %v1072_v43 = vmul.f32 %v1688_v7, %v1038_v15 }
 0x428   :  { %v1071_v4 = vmul.f32 %v1053_v27, %v2220_v2  ;;  %v1058_v8 = vmul.f32 %v1686_v23, %v1057_v21  ;;  %v1081_v2 = vpop.permute.xlu0 %1080 }
 0x429   :  { %v1083_v45 = vmul.f32 %v1081_v2, %v2002_v53  ;;  %v1084_v46 = vmul.f32 %v1081_v2, %v2004_v54  ;;  %v1085_v10 = vmul.f32 %v1081_v2, %v2016_v3  ;;  %v1086_v40 = vmul.f32 %v1081_v2, %v2315_v20 }
 0x42a   :  { %v2264_v9 = vadd.f32 %v1072_v43, %v1071_v4  ;;  %v1059_v13 = vadd.f32 %v1686_v23, %v1058_v8 }
 0x42b   :  { %v1087_v47 = vadd.f32 %v1083_v45, %v2010_v61  ;;  %v1088_v51 = vadd.f32 %v1084_v46, %v2013_v63  ;;  %v1089_v28 = vadd.f32 %v1085_v10, %v2020_v19  ;;  %v1090_v41 = vadd.f32 %v1086_v40, %v2316_v44 }
 0x42c   :  { %1689 = vtanh.f32 %v2264_v9  ;;  %v1063_v22 = vsel %vm1062_vm6, %v1686_v23, %v1059_v13 }
 0x42d   :  { %v1068_v34 = vsel %vm1065_vm7, %v1067_v26, %v1063_v22 }
 0x432   :  { %v1690_v30 = vpop.eup %1689 }
 0x433   :  { %v1075_v35 = vmul.f32 %v1690_v30, %v1068_v34 }
 0x435   :  { %v1091_v39 = vpack.c.bf16 %v1075_v35, %v1075_v35 }
 0x437   :  { %1100 = vmatmul.bf16.vlgmr.msra.gmra.mxu0 %v1091_v39  ;;  %1113 = vmatmul.bf16.vlgmr.msra.gmra.mxu1 %v1091_v39 }
 0x438   :  { %1126 = vmatmul.bf16.vlgmr.msra.gmra.mxu2 %v1091_v39  ;;  %1139 = vmatmul.bf16.vlgmr.msra.gmra.mxu3 %v1091_v39 }
 0x4b4   :  { %v1101_v57 = vpop.f32.mrf.mxu0  ;;  %v1114_v59 = vpop.f32.mrf.mxu1 }
 0x4b5   :  { %v1144_v60 = vadd.f32 %v1101_v57, %v1087_v47  ;;  %v1145_v1 = vadd.f32 %v1114_v59, %v1088_v51 }
 0x4b7   :  { %v1545_v12 = vmul.f32 -1.442695, %v1144_v60  ;;  %v1546_v14 = vmul.f32 -1.442695, %v1145_v1 }
 0x4b9   :  { %1691 = vpow2.f32 %v1545_v12 }
 0x4ba   :  { %1693 = vpow2.f32 %v1546_v14 }
 0x4bb   :  { %v1127_v29 = vpop.f32.mrf.mxu2  ;;  %v1140_v31 = vpop.f32.mrf.mxu3 }
 0x4bc   :  { %v1146_v37 = vadd.f32 %v1127_v29, %v1089_v28  ;;  %v1103_v48 = vpop.f32.mrf.mxu0  ;;  %v1116_v49 = vpop.f32.mrf.mxu1  ;;  %v1147_v25 = vadd.f32 %v1140_v31, %v1090_v41  ;;  %v1360_v28 = vld [vmem:[#allocation4 + $0x70] sm:$0xff]  ;;  %v1359_v29 = vld [vmem:[#allocation4 + $0x68] sm:$0xff]  ;;  %v1358_v31 = vld [vmem:[#allocation4 + $0x60] sm:$0xff] }
 0x4bd   :  { %v1356_v48 = vld [vmem:[#allocation4 + $0x50] sm:$0xff]  ;;  %v1216_v49 = vpop.permute.xlu1 %1215 }
 0x4be   :  { %v1547_v50 = vmul.f32 -1.442695, %v1146_v37  ;;  %v1357_v37 = vld [vmem:[#allocation4 + $0x58] sm:$0xff] }
 0x4bf   :  { %v1692_v5 = vpop.eup %1691 }
 0x4c0   :  { %v1694_v38 = vpop.eup %1693  ;;  %v1157_v16 = vadd.f32 1.0, %v1692_v5  ;;  %1695 = vpow2.f32 %v1547_v50  ;;  %v1355_v50 = vld [vmem:[#allocation4 + $0x48] sm:$0xff]  ;;  %v1218_v5 = vmul.f32 %v1216_v49, %v2002_v53 }
 0x4c1   :  { %v1158_v42 = vadd.f32 1.0, %v1694_v38  ;;  %v1219_v38 = vmul.f32 %v1216_v49, %v2004_v54 }
 0x4c2   :  { %1697 = vrcp.f32 %v1157_v16  ;;  %v1171_v32 = vand.u32 2147483648, %v1157_v16  ;;  %v1169_v21 = vand.u32 2147483647, %v1157_v16  ;;  %vm1165_vm10 = vweird.f32 %v1157_v16 }
 0x4c3   :  { %1699 = vrcp.f32 %v1158_v42  ;;  %v1129_v52 = vpop.f32.mrf.mxu2  ;;  %v1142_v0 = vpop.f32.mrf.mxu3  ;;  %v1186_v56 = vand.u32 2147483648, %v1158_v42  ;;  %v1184_v6 = vand.u32 2147483647, %v1158_v42  ;;  %vm1180_vm11 = vweird.f32 %v1158_v42 }
 0x4c4   :  { %v1172_v8 = vor.u32 1.1754944e-38, %v1171_v32  ;;  %vm1170_vm14 = vcmp.eq.f32.partialorder %v1169_v21, 8.507059e+37  ;;  %v1222_v40 = vadd.f32 %v1218_v5, %v2010_v61  ;;  %v1223_v52 = vadd.f32 %v1219_v38, %v2013_v63  ;;  %v1352_v0 = vld [vmem:[#allocation4 + $0x30] sm:$0xff]  ;;  %v1347_v32 = vld [vmem:[#allocation4 + $0x8] sm:$0xff] }
 0x4c5   :  { %v1187_v17 = vor.u32 1.1754944e-38, %v1186_v56  ;;  %vm1185_vm15 = vcmp.eq.f32.partialorder %v1184_v6, 8.507059e+37 }
 0x4c6   :  { %v1696_v58 = vpop.eup %1695 }
 0x4c7   :  { %v1159_v11 = vadd.f32 1.0, %v1696_v58 }
 0x4c8   :  { %v1698_v62 = vpop.eup %1697 }
 0x4c9   :  { %v1700_v23 = vpop.eup %1699  ;;  %v1161_v24 = vmul.f32 %v1698_v62, %v1157_v16  ;;  %1701 = vrcp.f32 %v1159_v11  ;;  %vm1166_vm8 = vweird.f32 %v1698_v62  ;;  %v1201_v51 = vand.u32 2147483648, %v1159_v11  ;;  %v1354_v16 = vld [vmem:[#allocation4 + $0x40] sm:$0xff] }
 0x4ca   :  { %v1176_v36 = vmul.f32 %v1700_v23, %v1158_v42  ;;  %1703 = vtanh.f32 %v1147_v25  ;;  %vm1181_vm9 = vweird.f32 %v1700_v23  ;;  %vm1167_vm12 = vmor %vm1165_vm10, %vm1166_vm8  ;;  %vm1195_vm1 = vweird.f32 %v1159_v11  ;;  %v1353_v42 = vld [vmem:[#allocation4 + $0x38] sm:$0xff]  ;;  %v1351_v25 = vld [vmem:[#allocation4 + $0x28] sm:$0xff] }
 0x4cb   :  { %v1162_v33 = vsub.f32 1.0, %v1161_v24  ;;  %vm1182_vm13 = vmor %vm1180_vm11, %vm1181_vm9  ;;  %v1199_v57 = vand.u32 2147483647, %v1159_v11  ;;  %v1202_v60 = vor.u32 1.1754944e-38, %v1201_v51  ;;  %v1350_v24 = vld [vmem:[#allocation4 + $0x20] sm:$0xff] }
 0x4cc   :  { %v1177_v55 = vsub.f32 1.0, %v1176_v36  ;;  %v1349_v36 = vld [vmem:[#allocation4 + $0x18] sm:$0xff] }
 0x4cd   :  { %v1163_v7 = vmul.f32 %v1698_v62, %v1162_v33  ;;  %vm1200_vm3 = vcmp.eq.f32.partialorder %v1199_v57, 8.507059e+37  ;;  %v1348_v33 = vld [vmem:[#allocation4 + $0x10] sm:$0xff] }
 0x4ce   :  { %v1178_v15 = vmul.f32 %v1700_v23, %v1177_v55 }
 0x4cf   :  { %v1702_v27 = vpop.eup %1701  ;;  %v1164_v43 = vadd.f32 %v1698_v62, %v1163_v7 }
 0x4d0   :  { %v1191_v4 = vmul.f32 %v1702_v27, %v1159_v11  ;;  %v1179_v13 = vadd.f32 %v1700_v23, %v1178_v15  ;;  %v1704_v22 = vpop.eup %1703  ;;  %vm1196_vm0 = vweird.f32 %v1702_v27 }
 0x4d1   :  { %v1168_v18 = vsel %vm1167_vm12, %v1698_v62, %v1164_v43  ;;  %vm1197_vm2 = vmor %vm1195_vm1, %vm1196_vm0 }
 0x4d2   :  { %v1192_v26 = vsub.f32 1.0, %v1191_v4  ;;  %v1173_v30 = vsel %vm1170_vm14, %v1172_v8, %v1168_v18  ;;  %v1183_v34 = vsel %vm1182_vm13, %v1700_v23, %v1179_v13  ;;  %v1220_v23 = vmul.f32 %v1216_v49, %v2016_v3  ;;  %v1346_v3 = vld [vmem:[#allocation4] sm:$0xff] }
 0x4d3   :  { %v1188_v35 = vsel %vm1185_vm15, %v1187_v17, %v1183_v34  ;;  %v1207_v39 = vmul.f32 %v1704_v22, %v1173_v30  ;;  %v1221_v8 = vmul.f32 %v1216_v49, %v2315_v20 }
 0x4d4   :  { %v1206_v2 = vmul.f32 %v1188_v35, %v2264_v9  ;;  %v1193_v45 = vmul.f32 %v1702_v27, %v1192_v26  ;;  %v1361_v9 = vld [vmem:[#allocation4 + $0x78] sm:$0xff]  ;;  %v1224_v61 = vadd.f32 %v1220_v23, %v2020_v19 }
 0x4d5   :  { %1366 = vmatpush.msra.mxu0 %v1361_v9  ;;  %v1225_v18 = vadd.f32 %v1221_v8, %v2316_v44 }
 0x4d6   :  { %v2276_v46 = vadd.f32 %v1207_v39, %v1206_v2  ;;  %v1194_v47 = vadd.f32 %v1702_v27, %v1193_v45 }
 0x4d7   :  { %1367 = vmatpush.msra.mxu0 %v1360_v28 }
 0x4d8   :  { %1705 = vtanh.f32 %v2276_v46  ;;  %v1198_v59 = vsel %vm1197_vm2, %v1702_v27, %v1194_v47 }
 0x4d9   :  { %v1203_v10 = vsel %vm1200_vm3, %v1202_v60, %v1198_v59  ;;  %1368 = vmatpush.msra.mxu0 %v1359_v29 }
 0x4db   :  { %1369 = vmatpush.msra.mxu0 %v1358_v31 }
 0x4dd   :  { %1370 = vmatpush.msra.mxu0 %v1357_v37 }
 0x4de   :  { %v1706_v1 = vpop.eup %1705 }
 0x4df   :  { %v1210_v12 = vmul.f32 %v1706_v1, %v1203_v10  ;;  %1371 = vmatpush.msra.mxu0 %v1356_v48 }
 0x4e1   :  { %v1226_v14 = vpack.c.bf16 %v1210_v12, %v1210_v12  ;;  %1372 = vmatpush.msra.mxu0 %v1355_v50 }
 0x4e3   :  { %1235 = vmatmul.bf16.vlgmr.msrb.gmra.mxu0 %v1226_v14  ;;  %1248 = vmatmul.bf16.vlgmr.msrb.gmra.mxu1 %v1226_v14 }
 0x4e4   :  { %1261 = vmatmul.bf16.vlgmr.msrb.gmra.mxu2 %v1226_v14  ;;  %1274 = vmatmul.bf16.vlgmr.msrb.gmra.mxu3 %v1226_v14 }
 0x4e5   :  { %1373 = vmatpush.msra.mxu0 %v1354_v16 }
 0x4e7   :  { %1374 = vmatpush.msra.mxu0 %v1353_v42 }
 0x4e9   :  { %1375 = vmatpush.msra.mxu0 %v1352_v0 }
 0x4eb   :  { %1376 = vmatpush.msra.mxu0 %v1351_v25 }
 0x4ed   :  { %1377 = vmatpush.msra.mxu0 %v1350_v24 }
 0x4ef   :  { %1378 = vmatpush.msra.mxu0 %v1349_v36 }
 0x4f1   :  { %1379 = vmatpush.msra.mxu0 %v1348_v33 }
 0x4f3   :  { %1380 = vmatpush.msra.mxu0 %v1347_v32 }
 0x4f5   :  { %1381 = vmatpush.msra.mxu0 %v1346_v3 }
 0x560   :  { %v1236_v58 = vpop.f32.mrf.mxu0  ;;  %v1249_v41 = vpop.f32.mrf.mxu1 }
 0x561   :  { %v1279_v11 = vadd.f32 %v1236_v58, %v1222_v40  ;;  %v1280_v62 = vadd.f32 %v1249_v41, %v1223_v52 }
 0x563   :  { %v1549_v53 = vmul.f32 -1.442695, %v1279_v11  ;;  %v1550_v54 = vmul.f32 -1.442695, %v1280_v62 }
 0x565   :  { %1707 = vpow2.f32 %v1549_v53 }
 0x566   :  { %1709 = vpow2.f32 %v1550_v54 }
 0x567   :  { %v1262_v63 = vpop.f32.mrf.mxu2  ;;  %v1275_v55 = vpop.f32.mrf.mxu3 }
 0x568   :  { %v1281_v56 = vadd.f32 %v1262_v63, %v1224_v61  ;;  %v1238_v7 = vpop.f32.mrf.mxu0  ;;  %v1251_v21 = vpop.f32.mrf.mxu1  ;;  %v1282_v30 = vadd.f32 %v1275_v55, %v1225_v18 }
 0x56a   :  { %v1551_v15 = vmul.f32 -1.442695, %v1281_v56 }
 0x56b   :  { %v1708_v6 = vpop.eup %1707 }
 0x56c   :  { %v1710_v27 = vpop.eup %1709  ;;  %v1292_v43 = vadd.f32 1.0, %v1708_v6  ;;  %1711 = vpow2.f32 %v1551_v15 }
 0x56d   :  { %v1293_v4 = vadd.f32 1.0, %v1710_v27 }
 0x56e   :  { %1713 = vrcp.f32 %v1292_v43  ;;  %v1306_v47 = vand.u32 2147483648, %v1292_v43  ;;  %v1304_v57 = vand.u32 2147483647, %v1292_v43  ;;  %vm1300_vm6 = vweird.f32 %v1292_v43 }
 0x56f   :  { %1715 = vrcp.f32 %v1293_v4  ;;  %v1264_v19 = vpop.f32.mrf.mxu2  ;;  %v1277_v13 = vpop.f32.mrf.mxu3  ;;  %v1321_v51 = vand.u32 2147483648, %v1293_v4  ;;  %v1319_v60 = vand.u32 2147483647, %v1293_v4  ;;  %vm1315_vm7 = vweird.f32 %v1293_v4 }
 0x570   :  { %v1307_v12 = vor.u32 1.1754944e-38, %v1306_v47  ;;  %vm1305_vm10 = vcmp.eq.f32.partialorder %v1304_v57, 8.507059e+37 }
 0x571   :  { %v1322_v9 = vor.u32 1.1754944e-38, %v1321_v51  ;;  %vm1320_vm11 = vcmp.eq.f32.partialorder %v1319_v60, 8.507059e+37 }
 0x572   :  { %v1712_v17 = vpop.eup %1711 }
 0x573   :  { %v1294_v22 = vadd.f32 1.0, %v1712_v17 }
 0x574   :  { %v1714_v26 = vpop.eup %1713 }
 0x575   :  { %v1716_v34 = vpop.eup %1715  ;;  %v1296_v35 = vmul.f32 %v1714_v26, %v1292_v43  ;;  %1717 = vrcp.f32 %v1294_v22  ;;  %vm1301_vm4 = vweird.f32 %v1714_v26  ;;  %v1336_v40 = vand.u32 2147483648, %v1294_v22 }
 0x576   :  { %v1311_v39 = vmul.f32 %v1716_v34, %v1293_v4  ;;  %1719 = vtanh.f32 %v1282_v30  ;;  %vm1316_vm5 = vweird.f32 %v1716_v34  ;;  %vm1302_vm8 = vmor %vm1300_vm6, %vm1301_vm4  ;;  %vm1330_vm13 = vweird.f32 %v1294_v22 }
 0x577   :  { %v1297_v2 = vsub.f32 1.0, %v1296_v35  ;;  %vm1317_vm9 = vmor %vm1315_vm7, %vm1316_vm5  ;;  %v1334_v52 = vand.u32 2147483647, %v1294_v22  ;;  %v1337_v58 = vor.u32 1.1754944e-38, %v1336_v40 }
 0x578   :  { %v1312_v45 = vsub.f32 1.0, %v1311_v39 }
 0x579   :  { %v1298_v20 = vmul.f32 %v1714_v26, %v1297_v2  ;;  %vm1335_vm15 = vcmp.eq.f32.partialorder %v1334_v52, 8.507059e+37 }
 0x57a   :  { %v1313_v59 = vmul.f32 %v1716_v34, %v1312_v45 }
 0x57b   :  { %v1718_v1 = vpop.eup %1717  ;;  %v1299_v44 = vadd.f32 %v1714_v26, %v1298_v20 }
 0x57c   :  { %v1326_v10 = vmul.f32 %v1718_v1, %v1294_v22  ;;  %v1314_v14 = vadd.f32 %v1716_v34, %v1313_v59  ;;  %v1720_v29 = vpop.eup %1719  ;;  %vm1331_vm12 = vweird.f32 %v1718_v1 }
 0x57d   :  { %v1303_v28 = vsel %vm1302_vm8, %v1714_v26, %v1299_v44  ;;  %vm1332_vm14 = vmor %vm1330_vm13, %vm1331_vm12 }
 0x57e   :  { %v1327_v31 = vsub.f32 1.0, %v1326_v10  ;;  %v1308_v37 = vsel %vm1305_vm10, %v1307_v12, %v1303_v28  ;;  %v1318_v48 = vsel %vm1317_vm9, %v1716_v34, %v1314_v14 }
 0x57f   :  { %v1323_v49 = vsel %vm1320_vm11, %v1322_v9, %v1318_v48  ;;  %v1342_v50 = vmul.f32 %v1720_v29, %v1308_v37 }
 0x580   :  { %v1341_v5 = vmul.f32 %v1323_v49, %v2276_v46  ;;  %v1328_v38 = vmul.f32 %v1718_v1, %v1327_v31  ;;  %v1594_v46 = vld [vmem:[%s2299_s5] ss:$0 sm:$0xff] }
 0x582   :  { %v1343_v16 = vadd.f32 %v1342_v50, %v1341_v5  ;;  %v1329_v42 = vadd.f32 %v1718_v1, %v1328_v38 }
 0x584   :  { %1721 = vtanh.f32 %v1343_v16  ;;  %v1333_v0 = vsel %vm1332_vm14, %v1718_v1, %v1329_v42 }
 0x585   :  { %v1338_v11 = vsel %vm1335_vm15, %v1337_v58, %v1333_v0 }
 0x58a   :  { %v1722_v41 = vpop.eup %1721 }
 0x58b   :  { %v1345_v62 = vmul.f32 %v1722_v41, %v1338_v11 }
 0x58d   :  { %1382 = vmatmul.f32.vlgmr.msra.gmra.mxu0 %v1345_v62 }
 0x60a   :  { %v1383_v25 = vpop.f32.mrf.mxu0 }
 0x60b   :  { %v1384_v23 = vadd.f32 %v1594_v46, %v1383_v25 }
 0x60d   :  { %1386 = vst [vmem:[%s2300_s6] sm:$0xff] %v1384_v23 }
 0x60e   :  { %1391 = vsyncpa [#allocation3], 1 }
 0x60f   :  { %1392 = vsyncpa [#allocation5], 1 }

</bundles_post_ra>
